<compile_context>
chip_gen: v7x
topology: tpu7x:2x2x1
jax: 0.10.0
libtpu: 0.0.40
codegen_flags: <defaults>
</compile_context>

<pallas_src>
import functools

import jax
import jax.numpy as jnp
from jax.experimental import pallas as pl
from jax.experimental.pallas import tpu as pltpu


# ----------------------------------------------------------------------------
# Kernels
# ----------------------------------------------------------------------------

def _encoder_lin_kernel(x_ref, w_ref, b_ref, o_ref):
    # x: (1, S, in) f32;  w: (in, out) bf16 (pre-transposed);  b: (1, out) f32
    x = x_ref[0]
    y = jnp.dot(x.astype(jnp.bfloat16), w_ref[...],
                preferred_element_type=jnp.float32) + b_ref[...]
    o_ref[0] = y


def _layernorm(x, gamma, beta, eps):
    mean = jnp.mean(x, axis=-1, keepdims=True)
    var = jnp.mean((x - mean) * (x - mean), axis=-1, keepdims=True)
    return (x - mean) * jax.lax.rsqrt(var + eps) * gamma + beta


def _encoder_layer_kernel(h_ref, wqkv_ref, bqkv_ref, wo_ref, bo_ref,
                          g1_ref, be1_ref, w1_ref, b1_ref, w2_ref, b2_ref,
                          g2_ref, be2_ref, o_ref, attn_scratch,
                          *, n_heads, scale, eps):
    # One batch element per grid step; everything below stays in VMEM.
    h = h_ref[0]                                   # (S, d_model) f32
    d_model = h.shape[-1]
    dh = d_model // n_heads

    # --- fused QKV projection (bf16 MXU inputs, f32 accumulate) -------------
    qkv = jnp.dot(h.astype(jnp.bfloat16), wqkv_ref[...],
                  preferred_element_type=jnp.float32) + bqkv_ref[...]

    # --- per-head scaled dot-product attention ------------------------------
    # TODO(synk): for long sequences (S >= 2k) switch to flash-style KV tiling
    #             so the SxS scores never exceed v7x's 64 MiB VMEM.
    for hd in range(n_heads):
        qh = qkv[:, hd * dh:(hd + 1) * dh]
        kh = qkv[:, d_model + hd * dh: d_model + (hd + 1) * dh]
        vh = qkv[:, 2 * d_model + hd * dh: 2 * d_model + (hd + 1) * dh]

        # contract last dims directly (no in-kernel k.T transpose)
        s = jax.lax.dot_general(
            qh.astype(jnp.bfloat16), kh.astype(jnp.bfloat16),
            (((1,), (1,)), ((), ())),
            preferred_element_type=jnp.float32) * scale          # (S, S)

        m = jnp.max(s, axis=-1, keepdims=True)
        p = jnp.exp(s - m)
        l = jnp.sum(p, axis=-1, keepdims=True)
        p = p * pl.reciprocal(l, approx=True)                    # EUP slot

        attn_scratch[:, hd * dh:(hd + 1) * dh] = jnp.dot(
            p.astype(jnp.bfloat16), vh.astype(jnp.bfloat16),
            preferred_element_type=jnp.float32)

    attn = jnp.dot(attn_scratch[...].astype(jnp.bfloat16), wo_ref[...],
                   preferred_element_type=jnp.float32) + bo_ref[...]

    # --- add & norm 1 (dropout disabled in eval) -----------------------------
    x1 = _layernorm(h + attn, g1_ref[...], be1_ref[...], eps)

    # --- feed-forward (linear1 + ReLU + linear2, fused) ----------------------
    ff = jnp.dot(x1.astype(jnp.bfloat16), w1_ref[...],
                 preferred_element_type=jnp.float32) + b1_ref[...]
    ff = jnp.maximum(ff, 0.0)
    ff = jnp.dot(ff.astype(jnp.bfloat16), w2_ref[...],
                 preferred_element_type=jnp.float32) + b2_ref[...]

    # --- add & norm 2 ---------------------------------------------------------
    o_ref[0] = _layernorm(x1 + ff, g2_ref[...], be2_ref[...], eps)


def _revert_loss_kernel(h_ref, y_ref, keep_ref, w_ref, b_ref,
                        out_ref, sumsq_ref, cnt_ref):
    # revert_lin fused with the masked-MSE partial reduction (per batch elem).
    h = h_ref[0]                                   # (S, d_model)
    out = jnp.dot(h.astype(jnp.bfloat16), w_ref[...],
                  preferred_element_type=jnp.float32) + b_ref[...]
    out_ref[0] = out

    keep = keep_ref[0]                             # (S, 1) float {0,1}
    d = (out - y_ref[0]) * keep
    # full-block stores (shape (1,1,1)) -- avoids scalar VMEM stores
    sumsq_ref[...] = jnp.reshape(jnp.sum(d * d), (1, 1, 1))
    cnt_ref[...] = jnp.reshape(jnp.sum(keep), (1, 1, 1))


# ----------------------------------------------------------------------------
# pallas_call wrappers
# ----------------------------------------------------------------------------

def _const_spec(shape):
    n = len(shape)
    return pl.BlockSpec(shape, lambda b: (0,) * n)


def encoder_linear(xb, w, b):
    # xb: (N, S, in)  ->  (N, S, out)
    N, S, in_dim = xb.shape
    out_dim = w.shape[1]
    return pl.pallas_call(
        _encoder_lin_kernel,
        grid=(N,),
        in_specs=[
            pl.BlockSpec((1, S, in_dim), lambda bi: (bi, 0, 0)),
            _const_spec((in_dim, out_dim)),
            _const_spec((1, out_dim)),
        ],
        out_specs=pl.BlockSpec((1, S, out_dim), lambda bi: (bi, 0, 0)),
        out_shape=jax.ShapeDtypeStruct((N, S, out_dim), jnp.float32),
        compiler_params=pltpu.CompilerParams(dimension_semantics=("parallel",)),
    )(xb, w, b)


def encoder_layer(h, layer, *, n_heads, eps=1e-5):
    N, S, d_model = h.shape
    dim_ff = layer["linear1"][0].shape[1]
    scale = 1.0 / float((d_model // n_heads) ** 0.5)

    return pl.pallas_call(
        functools.partial(_encoder_layer_kernel,
                          n_heads=n_heads, scale=scale, eps=eps),
        grid=(N,),
        in_specs=[
            pl.BlockSpec((1, S, d_model), lambda bi: (bi, 0, 0)),
            _const_spec((d_model, 3 * d_model)),   # in_proj W (in,out) bf16
            _const_spec((1, 3 * d_model)),         # in_proj b
            _const_spec((d_model, d_model)),       # out_proj W
            _const_spec((1, d_model)),             # out_proj b
            _const_spec((1, d_model)),             # norm1 gamma
            _const_spec((1, d_model)),             # norm1 beta
            _const_spec((d_model, dim_ff)),        # linear1 W
            _const_spec((1, dim_ff)),              # linear1 b
            _const_spec((dim_ff, d_model)),        # linear2 W
            _const_spec((1, d_model)),             # linear2 b
            _const_spec((1, d_model)),             # norm2 gamma
            _const_spec((1, d_model)),             # norm2 beta
        ],
        out_specs=pl.BlockSpec((1, S, d_model), lambda bi: (bi, 0, 0)),
        out_shape=jax.ShapeDtypeStruct((N, S, d_model), jnp.float32),
        scratch_shapes=[pltpu.VMEM((S, d_model), jnp.float32)],
        compiler_params=pltpu.CompilerParams(dimension_semantics=("parallel",)),
    )(h,
      layer["in_proj"][0], layer["in_proj"][1],
      layer["out_proj"][0], layer["out_proj"][1],
      layer["norm1"][0], layer["norm1"][1],
      layer["linear1"][0], layer["linear1"][1],
      layer["linear2"][0], layer["linear2"][1],
      layer["norm2"][0], layer["norm2"][1])


def revert_and_loss(h, y, keep, w, b):
    # h: (N, S, d_model), y: (N, S, inp), keep: (N, S, 1) float
    N, S, d_model = h.shape
    inp_dim = w.shape[1]
    return pl.pallas_call(
        _revert_loss_kernel,
        grid=(N,),
        in_specs=[
            pl.BlockSpec((1, S, d_model), lambda bi: (bi, 0, 0)),
            pl.BlockSpec((1, S, inp_dim), lambda bi: (bi, 0, 0)),
            pl.BlockSpec((1, S, 1), lambda bi: (bi, 0, 0)),
            _const_spec((d_model, inp_dim)),
            _const_spec((1, inp_dim)),
        ],
        out_specs=(
            pl.BlockSpec((1, S, inp_dim), lambda bi: (bi, 0, 0)),
            pl.BlockSpec((1, 1, 1), lambda bi: (bi, 0, 0)),
            pl.BlockSpec((1, 1, 1), lambda bi: (bi, 0, 0)),
        ),
        out_shape=(
            jax.ShapeDtypeStruct((N, S, inp_dim), jnp.float32),
            jax.ShapeDtypeStruct((N, 1, 1), jnp.float32),
            jax.ShapeDtypeStruct((N, 1, 1), jnp.float32),
        ),
        compiler_params=pltpu.CompilerParams(dimension_semantics=("parallel",)),
    )(h, y, keep, w, b)


# ----------------------------------------------------------------------------
# Parameters (deterministic synthetic init; weights pre-transposed, bf16)
# ----------------------------------------------------------------------------

def init_params(key, inp_dim, d_model, dim_ff, n_layers):
    def nxt():
        nonlocal key
        key, sub = jax.random.split(key)
        return sub

    def lin(in_d, out_d):
        # weight stored (in, out) in bf16 -> feeds MXU without in-kernel .T
        w = (jax.random.normal(nxt(), (in_d, out_d), jnp.float32) * 0.05
             ).astype(jnp.bfloat16)
        b = (jax.random.normal(nxt(), (out_d,), jnp.float32) * 0.01
             ).reshape(1, out_d)
        return w, b

    params = {"encoder_lin": lin(inp_dim, d_model),
              "revert_lin": lin(d_model, inp_dim),
              "layers": []}
    for _ in range(n_layers):
        params["layers"].append({
            "in_proj": lin(d_model, 3 * d_model),
            "out_proj": lin(d_model, d_model),
            "linear1": lin(d_model, dim_ff),
            "linear2": lin(dim_ff, d_model),
            "norm1": (jnp.ones((1, d_model), jnp.float32),
                      jnp.zeros((1, d_model), jnp.float32)),
            "norm2": (jnp.ones((1, d_model), jnp.float32),
                      jnp.zeros((1, d_model), jnp.float32)),
        })
    return params


# ----------------------------------------------------------------------------
# Forward pass (eval mode)
# ----------------------------------------------------------------------------

def simple_transformer_forward(params, x, mask, *, n_heads):
    S, N, inp_dim = x.shape

    # single layout change to batch-major; per-layer host transposes are gone
    xb = jnp.transpose(x, (1, 0, 2))                       # (N, S, inp_dim)
    keep = jnp.transpose(jnp.logical_not(mask).astype(jnp.float32),
                         (1, 0)).reshape(N, S, 1)

    h = encoder_linear(xb, *params["encoder_lin"])         # (N, S, d_model)
    for layer in params["layers"]:
        h = encoder_layer(h, layer, n_heads=n_heads)       # fused layer kernel

    out_b, sumsq, cnt = revert_and_loss(h, xb, keep, *params["revert_lin"])

    # eval-mode loss: MSE over unmasked rows, x[~mask] vs y[~mask]
    loss = jnp.sum(sumsq) / (jnp.sum(cnt) * jnp.float32(inp_dim))

    out = jnp.transpose(out_b, (1, 0, 2))                  # back to (S, N, inp)
    return out, loss, mask


# ----------------------------------------------------------------------------
# Driver
# ----------------------------------------------------------------------------

if __name__ == "__main__":
    # small shapes consistent with the module's forward
    S, N = 8, 2            # sequence length, batch
    INP_DIM = 16           # module default 50, scaled down
    D_MODEL = 32           # module default 256, scaled down
    N_HEADS = 4            # module default 8, scaled down (d_model % heads == 0)
    N_LAYERS = 2           # module default 3, scaled down
    DIM_FF = 64            # TransformerEncoderLayer default 2048, scaled down

    key = jax.random.PRNGKey(0)
    k_param, k_x, k_mask = jax.random.split(key, 3)

    params = init_params(k_param, INP_DIM, D_MODEL, DIM_FF, N_LAYERS)
    x = jax.random.normal(k_x, (S, N, INP_DIM), jnp.float32)
    mask = jax.random.bernoulli(k_mask, 0.25, (S, N))      # True = masked loc

    fwd = jax.jit(functools.partial(simple_transformer_forward, n_heads=N_HEADS))
    out, loss, mask_out = fwd(params, x, mask)
    jax.block_until_ready((out, loss, mask_out))

    assert out.shape == (S, N, INP_DIM)
    assert loss.shape == ()
    assert bool(jnp.isfinite(loss))
    print("KERNEL_OK")
</pallas_src>

<mosaic_0001>
module attributes {stable_mosaic.version = 11 : i64} {
  func.func @_encoder_lin_kernel(%arg0: i32, %arg1: memref<1x8x16xf32, #tpu.memory_space<vmem>>, %arg2: memref<16x32xbf16, #tpu.memory_space<vmem>>, %arg3: memref<1x32xf32, #tpu.memory_space<vmem>>, %arg4: memref<1x8x32xf32, #tpu.memory_space<vmem>>) attributes {dimension_semantics = [#tpu.dimension_semantics<parallel>], iteration_bounds = array<i64: 2>, scalar_prefetch = 0 : i64, scratch_operands = 0 : i64, tpu.core_type = #tpu.core_type<tc>, window_params = [{transform_indices = @transform_0, window_bounds = array<i64: 1, 8, 16>}, {pipeline_mode = #tpu.pipeline_mode<synchronous>, transform_indices = @transform_1, window_bounds = array<i64: 16, 32>}, {pipeline_mode = #tpu.pipeline_mode<synchronous>, transform_indices = @transform_2, window_bounds = array<i64: 1, 32>}, {transform_indices = @transform_3, window_bounds = array<i64: 1, 8, 32>}]} {
    %c0 = arith.constant 0 : index
    %c0_0 = arith.constant 0 : index
    %c0_1 = arith.constant 0 : index
    %0 = vector.load %arg1[%c0, %c0_0, %c0_1] : memref<1x8x16xf32, #tpu.memory_space<vmem>>, vector<1x8x16xf32>
    %1 = vector.shape_cast %0 : vector<1x8x16xf32> to vector<8x16xf32>
    %2 = arith.truncf %1 : vector<8x16xf32> to vector<8x16xbf16>
    %c0_2 = arith.constant 0 : index
    %c0_3 = arith.constant 0 : index
    %3 = vector.load %arg2[%c0_2, %c0_3] : memref<16x32xbf16, #tpu.memory_space<vmem>>, vector<16x32xbf16>
    %cst = arith.constant dense<0.000000e+00> : vector<8x32xf32>
    %4 = tpu.matmul %2, %3, %cst {dimension_numbers = #tpu.dot_dimension_numbers<[1], [0], [0], [1], [0, 0, 1, 1], [], []>} : vector<8x16xbf16>, vector<16x32xbf16>, vector<8x32xf32> -> vector<8x32xf32>
    %c0_4 = arith.constant 0 : index
    %c0_5 = arith.constant 0 : index
    %5 = vector.load %arg3[%c0_4, %c0_5] : memref<1x32xf32, #tpu.memory_space<vmem>>, vector<1x32xf32>
    %6 = vector.broadcast %5 : vector<1x32xf32> to vector<8x32xf32>
    %7 = arith.addf %4, %6 : vector<8x32xf32>
    %c0_6 = arith.constant 0 : index
    %c0_7 = arith.constant 0 : index
    %c0_8 = arith.constant 0 : index
    %8 = vector.load %arg4[%c0_6, %c0_7, %c0_8] : memref<1x8x32xf32, #tpu.memory_space<vmem>>, vector<1x8x32xf32>
    %9 = vector.shape_cast %8 : vector<1x8x32xf32> to vector<8x32xf32>
    %10 = vector.shape_cast %7 : vector<8x32xf32> to vector<1x8x32xf32>
    tpu.vector_store %arg4[%c0_6, %c0_7, %c0_8], %10 {strides = array<i32>} : memref<1x8x32xf32, #tpu.memory_space<vmem>>, vector<1x8x32xf32>,
    return
  }
  func.func @transform_0(%arg0: i32) -> (i32, i32, i32) {
    %c0_i32 = arith.constant 0 : i32
    %c0_i32_0 = arith.constant 0 : i32
    %c0_i32_1 = arith.constant 0 : i32
    return %arg0, %c0_i32, %c0_i32_0 : i32, i32, i32
  }
  func.func @transform_1(%arg0: i32) -> (i32, i32) {
    %c0_i32 = arith.constant 0 : i32
    %c0_i32_0 = arith.constant 0 : i32
    %c0_i32_1 = arith.constant 0 : i32
    return %c0_i32, %c0_i32_0 : i32, i32
  }
  func.func @transform_2(%arg0: i32) -> (i32, i32) {
    %c0_i32 = arith.constant 0 : i32
    %c0_i32_0 = arith.constant 0 : i32
    %c0_i32_1 = arith.constant 0 : i32
    return %c0_i32, %c0_i32_0 : i32, i32
  }
  func.func @transform_3(%arg0: i32) -> (i32, i32, i32) {
    %c0_i32 = arith.constant 0 : i32
    %c0_i32_0 = arith.constant 0 : i32
    %c0_i32_1 = arith.constant 0 : i32
    return %arg0, %c0_i32, %c0_i32_0 : i32, i32, i32
  }
}

module attributes {stable_mosaic.version = 11 : i64} {
  func.func @_encoder_layer_kernel(%arg0: i32, %arg1: memref<1x8x32xf32, #tpu.memory_space<vmem>>, %arg2: memref<32x96xbf16, #tpu.memory_space<vmem>>, %arg3: memref<1x96xf32, #tpu.memory_space<vmem>>, %arg4: memref<32x32xbf16, #tpu.memory_space<vmem>>, %arg5: memref<1x32xf32, #tpu.memory_space<vmem>>, %arg6: memref<1x32xf32, #tpu.memory_space<vmem>>, %arg7: memref<1x32xf32, #tpu.memory_space<vmem>>, %arg8: memref<32x64xbf16, #tpu.memory_space<vmem>>, %arg9: memref<1x64xf32, #tpu.memory_space<vmem>>, %arg10: memref<64x32xbf16, #tpu.memory_space<vmem>>, %arg11: memref<1x32xf32, #tpu.memory_space<vmem>>, %arg12: memref<1x32xf32, #tpu.memory_space<vmem>>, %arg13: memref<1x32xf32, #tpu.memory_space<vmem>>, %arg14: memref<1x8x32xf32, #tpu.memory_space<vmem>>, %arg15: memref<8x32xf32, #tpu.memory_space<vmem>>) attributes {dimension_semantics = [#tpu.dimension_semantics<parallel>], iteration_bounds = array<i64: 2>, scalar_prefetch = 0 : i64, scratch_operands = 1 : i64, tpu.core_type = #tpu.core_type<tc>, window_params = [{transform_indices = @transform_0, window_bounds = array<i64: 1, 8, 32>}, {pipeline_mode = #tpu.pipeline_mode<synchronous>, transform_indices = @transform_1, window_bounds = array<i64: 32, 96>}, {pipeline_mode = #tpu.pipeline_mode<synchronous>, transform_indices = @transform_2, window_bounds = array<i64: 1, 96>}, {pipeline_mode = #tpu.pipeline_mode<synchronous>, transform_indices = @transform_3, window_bounds = array<i64: 32, 32>}, {pipeline_mode = #tpu.pipeline_mode<synchronous>, transform_indices = @transform_4, window_bounds = array<i64: 1, 32>}, {pipeline_mode = #tpu.pipeline_mode<synchronous>, transform_indices = @transform_5, window_bounds = array<i64: 1, 32>}, {pipeline_mode = #tpu.pipeline_mode<synchronous>, transform_indices = @transform_6, window_bounds = array<i64: 1, 32>}, {pipeline_mode = #tpu.pipeline_mode<synchronous>, transform_indices = @transform_7, window_bounds = array<i64: 32, 64>}, {pipeline_mode = #tpu.pipeline_mode<synchronous>, transform_indices = @transform_8, window_bounds = array<i64: 1, 64>}, {pipeline_mode = #tpu.pipeline_mode<synchronous>, transform_indices = @transform_9, window_bounds = array<i64: 64, 32>}, {pipeline_mode = #tpu.pipeline_mode<synchronous>, transform_indices = @transform_10, window_bounds = array<i64: 1, 32>}, {pipeline_mode = #tpu.pipeline_mode<synchronous>, transform_indices = @transform_11, window_bounds = array<i64: 1, 32>}, {pipeline_mode = #tpu.pipeline_mode<synchronous>, transform_indices = @transform_12, window_bounds = array<i64: 1, 32>}, {transform_indices = @transform_13, window_bounds = array<i64: 1, 8, 32>}]} {
    %c0 = arith.constant 0 : index
    %c0_0 = arith.constant 0 : index
    %c0_1 = arith.constant 0 : index
    %0 = vector.load %arg1[%c0, %c0_0, %c0_1] : memref<1x8x32xf32, #tpu.memory_space<vmem>>, vector<1x8x32xf32>
    %1 = vector.shape_cast %0 : vector<1x8x32xf32> to vector<8x32xf32>
    %2 = arith.truncf %1 : vector<8x32xf32> to vector<8x32xbf16>
    %c0_2 = arith.constant 0 : index
    %c0_3 = arith.constant 0 : index
    %3 = vector.load %arg2[%c0_2, %c0_3] : memref<32x96xbf16, #tpu.memory_space<vmem>>, vector<32x96xbf16>
    %cst = arith.constant dense<0.000000e+00> : vector<8x96xf32>
    %4 = tpu.matmul %2, %3, %cst {dimension_numbers = #tpu.dot_dimension_numbers<[1], [0], [0], [1], [0, 0, 1, 1], [], []>} : vector<8x32xbf16>, vector<32x96xbf16>, vector<8x96xf32> -> vector<8x96xf32>
    %c0_4 = arith.constant 0 : index
    %c0_5 = arith.constant 0 : index
    %5 = vector.load %arg3[%c0_4, %c0_5] : memref<1x96xf32, #tpu.memory_space<vmem>>, vector<1x96xf32>
    %6 = vector.broadcast %5 : vector<1x96xf32> to vector<8x96xf32>
    %7 = arith.addf %4, %6 : vector<8x96xf32>
    %8 = vector.extract_strided_slice %7 {offsets = [0, 0], sizes = [8, 8], strides = [1, 1]} : vector<8x96xf32> to vector<8x8xf32>
    %9 = vector.extract_strided_slice %7 {offsets = [0, 32], sizes = [8, 8], strides = [1, 1]} : vector<8x96xf32> to vector<8x8xf32>
    %10 = vector.extract_strided_slice %7 {offsets = [0, 64], sizes = [8, 8], strides = [1, 1]} : vector<8x96xf32> to vector<8x8xf32>
    %11 = arith.truncf %8 : vector<8x8xf32> to vector<8x8xbf16>
    %12 = arith.truncf %9 : vector<8x8xf32> to vector<8x8xbf16>
    %cst_6 = arith.constant dense<0.000000e+00> : vector<8x8xf32>
    %13 = tpu.matmul %11, %12, %cst_6 {dimension_numbers = #tpu.dot_dimension_numbers<[1], [1], [0], [0], [0, 0, 1, 0], [], []>} : vector<8x8xbf16>, vector<8x8xbf16>, vector<8x8xf32> -> vector<8x8xf32>
    %cst_7 = arith.constant 0.353553385 : f32
    %14 = vector.broadcast %cst_7 : f32 to vector<8x8xf32>
    %15 = arith.mulf %13, %14 : vector<8x8xf32>
    %cst_8 = arith.constant dense<0xFF800000> : vector<8xf32>
    %16 = vector.multi_reduction <maximumf>, %15, %cst_8 [1] : vector<8x8xf32> to vector<8xf32>
    %17 = vector.shape_cast %16 : vector<8xf32> to vector<8x1xf32>
    %18 = vector.broadcast %17 : vector<8x1xf32> to vector<8x8xf32>
    %19 = arith.subf %15, %18 : vector<8x8xf32>
    %20 = math.exp %19 : vector<8x8xf32>
    %cst_9 = arith.constant dense<0.000000e+00> : vector<8xf32>
    %21 = vector.multi_reduction <add>, %20, %cst_9 [1] : vector<8x8xf32> to vector<8xf32>
    %22 = vector.shape_cast %21 : vector<8xf32> to vector<8x1xf32>
    %23 = tpu.reciprocal %22 {approx = true} : vector<8x1xf32> -> vector<8x1xf32>
    %24 = vector.broadcast %23 : vector<8x1xf32> to vector<8x8xf32>
    %25 = arith.mulf %20, %24 : vector<8x8xf32>
    %26 = arith.truncf %25 : vector<8x8xf32> to vector<8x8xbf16>
    %27 = arith.truncf %10 : vector<8x8xf32> to vector<8x8xbf16>
    %cst_10 = arith.constant dense<0.000000e+00> : vector<8x8xf32>
    %28 = tpu.matmul %26, %27, %cst_10 {dimension_numbers = #tpu.dot_dimension_numbers<[1], [0], [0], [1], [0, 0, 1, 1], [], []>} : vector<8x8xbf16>, vector<8x8xbf16>, vector<8x8xf32> -> vector<8x8xf32>
    %c0_11 = arith.constant 0 : index
    %c0_12 = arith.constant 0 : index
    %29 = vector.load %arg15[%c0_11, %c0_12] : memref<8x32xf32, #tpu.memory_space<vmem>>, vector<8x8xf32>
    tpu.vector_store %arg15[%c0_11, %c0_12], %28 {strides = array<i32>} : memref<8x32xf32, #tpu.memory_space<vmem>>, vector<8x8xf32>,
    %30 = vector.extract_strided_slice %7 {offsets = [0, 8], sizes = [8, 8], strides = [1, 1]} : vector<8x96xf32> to vector<8x8xf32>
    %31 = vector.extract_strided_slice %7 {offsets = [0, 40], sizes = [8, 8], strides = [1, 1]} : vector<8x96xf32> to vector<8x8xf32>
    %32 = vector.extract_strided_slice %7 {offsets = [0, 72], sizes = [8, 8], strides = [1, 1]} : vector<8x96xf32> to vector<8x8xf32>
    %33 = arith.truncf %30 : vector<8x8xf32> to vector<8x8xbf16>
    %34 = arith.truncf %31 : vector<8x8xf32> to vector<8x8xbf16>
    %cst_13 = arith.constant dense<0.000000e+00> : vector<8x8xf32>
    %35 = tpu.matmul %33, %34, %cst_13 {dimension_numbers = #tpu.dot_dimension_numbers<[1], [1], [0], [0], [0, 0, 1, 0], [], []>} : vector<8x8xbf16>, vector<8x8xbf16>, vector<8x8xf32> -> vector<8x8xf32>
    %cst_14 = arith.constant 0.353553385 : f32
    %36 = vector.broadcast %cst_14 : f32 to vector<8x8xf32>
    %37 = arith.mulf %35, %36 : vector<8x8xf32>
    %cst_15 = arith.constant dense<0xFF800000> : vector<8xf32>
    %38 = vector.multi_reduction <maximumf>, %37, %cst_15 [1] : vector<8x8xf32> to vector<8xf32>
    %39 = vector.shape_cast %38 : vector<8xf32> to vector<8x1xf32>
    %40 = vector.broadcast %39 : vector<8x1xf32> to vector<8x8xf32>
    %41 = arith.subf %37, %40 : vector<8x8xf32>
    %42 = math.exp %41 : vector<8x8xf32>
    %cst_16 = arith.constant dense<0.000000e+00> : vector<8xf32>
    %43 = vector.multi_reduction <add>, %42, %cst_16 [1] : vector<8x8xf32> to vector<8xf32>
    %44 = vector.shape_cast %43 : vector<8xf32> to vector<8x1xf32>
    %45 = tpu.reciprocal %44 {approx = true} : vector<8x1xf32> -> vector<8x1xf32>
    %46 = vector.broadcast %45 : vector<8x1xf32> to vector<8x8xf32>
    %47 = arith.mulf %42, %46 : vector<8x8xf32>
    %48 = arith.truncf %47 : vector<8x8xf32> to vector<8x8xbf16>
    %49 = arith.truncf %32 : vector<8x8xf32> to vector<8x8xbf16>
    %cst_17 = arith.constant dense<0.000000e+00> : vector<8x8xf32>
    %50 = tpu.matmul %48, %49, %cst_17 {dimension_numbers = #tpu.dot_dimension_numbers<[1], [0], [0], [1], [0, 0, 1, 1], [], []>} : vector<8x8xbf16>, vector<8x8xbf16>, vector<8x8xf32> -> vector<8x8xf32>
    %c0_18 = arith.constant 0 : index
    %c8 = arith.constant 8 : index
    %51 = vector.load %arg15[%c0_18, %c8] : memref<8x32xf32, #tpu.memory_space<vmem>>, vector<8x8xf32>
    tpu.vector_store %arg15[%c0_18, %c8], %50 {strides = array<i32>} : memref<8x32xf32, #tpu.memory_space<vmem>>, vector<8x8xf32>,
    %52 = vector.extract_strided_slice %7 {offsets = [0, 16], sizes = [8, 8], strides = [1, 1]} : vector<8x96xf32> to vector<8x8xf32>
    %53 = vector.extract_strided_slice %7 {offsets = [0, 48], sizes = [8, 8], strides = [1, 1]} : vector<8x96xf32> to vector<8x8xf32>
    %54 = vector.extract_strided_slice %7 {offsets = [0, 80], sizes = [8, 8], strides = [1, 1]} : vector<8x96xf32> to vector<8x8xf32>
    %55 = arith.truncf %52 : vector<8x8xf32> to vector<8x8xbf16>
    %56 = arith.truncf %53 : vector<8x8xf32> to vector<8x8xbf16>
    %cst_19 = arith.constant dense<0.000000e+00> : vector<8x8xf32>
    %57 = tpu.matmul %55, %56, %cst_19 {dimension_numbers = #tpu.dot_dimension_numbers<[1], [1], [0], [0], [0, 0, 1, 0], [], []>} : vector<8x8xbf16>, vector<8x8xbf16>, vector<8x8xf32> -> vector<8x8xf32>
    %cst_20 = arith.constant 0.353553385 : f32
    %58 = vector.broadcast %cst_20 : f32 to vector<8x8xf32>
    %59 = arith.mulf %57, %58 : vector<8x8xf32>
    %cst_21 = arith.constant dense<0xFF800000> : vector<8xf32>
    %60 = vector.multi_reduction <maximumf>, %59, %cst_21 [1] : vector<8x8xf32> to vector<8xf32>
    %61 = vector.shape_cast %60 : vector<8xf32> to vector<8x1xf32>
    %62 = vector.broadcast %61 : vector<8x1xf32> to vector<8x8xf32>
    %63 = arith.subf %59, %62 : vector<8x8xf32>
    %64 = math.exp %63 : vector<8x8xf32>
    %cst_22 = arith.constant dense<0.000000e+00> : vector<8xf32>
    %65 = vector.multi_reduction <add>, %64, %cst_22 [1] : vector<8x8xf32> to vector<8xf32>
    %66 = vector.shape_cast %65 : vector<8xf32> to vector<8x1xf32>
    %67 = tpu.reciprocal %66 {approx = true} : vector<8x1xf32> -> vector<8x1xf32>
    %68 = vector.broadcast %67 : vector<8x1xf32> to vector<8x8xf32>
    %69 = arith.mulf %64, %68 : vector<8x8xf32>
    %70 = arith.truncf %69 : vector<8x8xf32> to vector<8x8xbf16>
    %71 = arith.truncf %54 : vector<8x8xf32> to vector<8x8xbf16>
    %cst_23 = arith.constant dense<0.000000e+00> : vector<8x8xf32>
    %72 = tpu.matmul %70, %71, %cst_23 {dimension_numbers = #tpu.dot_dimension_numbers<[1], [0], [0], [1], [0, 0, 1, 1], [], []>} : vector<8x8xbf16>, vector<8x8xbf16>, vector<8x8xf32> -> vector<8x8xf32>
    %c0_24 = arith.constant 0 : index
    %c16 = arith.constant 16 : index
    %73 = vector.load %arg15[%c0_24, %c16] : memref<8x32xf32, #tpu.memory_space<vmem>>, vector<8x8xf32>
    tpu.vector_store %arg15[%c0_24, %c16], %72 {strides = array<i32>} : memref<8x32xf32, #tpu.memory_space<vmem>>, vector<8x8xf32>,
    %74 = vector.extract_strided_slice %7 {offsets = [0, 24], sizes = [8, 8], strides = [1, 1]} : vector<8x96xf32> to vector<8x8xf32>
    %75 = vector.extract_strided_slice %7 {offsets = [0, 56], sizes = [8, 8], strides = [1, 1]} : vector<8x96xf32> to vector<8x8xf32>
    %76 = vector.extract_strided_slice %7 {offsets = [0, 88], sizes = [8, 8], strides = [1, 1]} : vector<8x96xf32> to vector<8x8xf32>
    %77 = arith.truncf %74 : vector<8x8xf32> to vector<8x8xbf16>
    %78 = arith.truncf %75 : vector<8x8xf32> to vector<8x8xbf16>
    %cst_25 = arith.constant dense<0.000000e+00> : vector<8x8xf32>
    %79 = tpu.matmul %77, %78, %cst_25 {dimension_numbers = #tpu.dot_dimension_numbers<[1], [1], [0], [0], [0, 0, 1, 0], [], []>} : vector<8x8xbf16>, vector<8x8xbf16>, vector<8x8xf32> -> vector<8x8xf32>
    %cst_26 = arith.constant 0.353553385 : f32
    %80 = vector.broadcast %cst_26 : f32 to vector<8x8xf32>
    %81 = arith.mulf %79, %80 : vector<8x8xf32>
    %cst_27 = arith.constant dense<0xFF800000> : vector<8xf32>
    %82 = vector.multi_reduction <maximumf>, %81, %cst_27 [1] : vector<8x8xf32> to vector<8xf32>
    %83 = vector.shape_cast %82 : vector<8xf32> to vector<8x1xf32>
    %84 = vector.broadcast %83 : vector<8x1xf32> to vector<8x8xf32>
    %85 = arith.subf %81, %84 : vector<8x8xf32>
    %86 = math.exp %85 : vector<8x8xf32>
    %cst_28 = arith.constant dense<0.000000e+00> : vector<8xf32>
    %87 = vector.multi_reduction <add>, %86, %cst_28 [1] : vector<8x8xf32> to vector<8xf32>
    %88 = vector.shape_cast %87 : vector<8xf32> to vector<8x1xf32>
    %89 = tpu.reciprocal %88 {approx = true} : vector<8x1xf32> -> vector<8x1xf32>
    %90 = vector.broadcast %89 : vector<8x1xf32> to vector<8x8xf32>
    %91 = arith.mulf %86, %90 : vector<8x8xf32>
    %92 = arith.truncf %91 : vector<8x8xf32> to vector<8x8xbf16>
    %93 = arith.truncf %76 : vector<8x8xf32> to vector<8x8xbf16>
    %cst_29 = arith.constant dense<0.000000e+00> : vector<8x8xf32>
    %94 = tpu.matmul %92, %93, %cst_29 {dimension_numbers = #tpu.dot_dimension_numbers<[1], [0], [0], [1], [0, 0, 1, 1], [], []>} : vector<8x8xbf16>, vector<8x8xbf16>, vector<8x8xf32> -> vector<8x8xf32>
    %c0_30 = arith.constant 0 : index
    %c24 = arith.constant 24 : index
    %95 = vector.load %arg15[%c0_30, %c24] : memref<8x32xf32, #tpu.memory_space<vmem>>, vector<8x8xf32>
    tpu.vector_store %arg15[%c0_30, %c24], %94 {strides = array<i32>} : memref<8x32xf32, #tpu.memory_space<vmem>>, vector<8x8xf32>,
    %c0_31 = arith.constant 0 : index
    %c0_32 = arith.constant 0 : index
    %96 = vector.load %arg15[%c0_31, %c0_32] : memref<8x32xf32, #tpu.memory_space<vmem>>, vector<8x32xf32>
    %97 = arith.truncf %96 : vector<8x32xf32> to vector<8x32xbf16>
    %c0_33 = arith.constant 0 : index
    %c0_34 = arith.constant 0 : index
    %98 = vector.load %arg4[%c0_33, %c0_34] : memref<32x32xbf16, #tpu.memory_space<vmem>>, vector<32x32xbf16>
    %cst_35 = arith.constant dense<0.000000e+00> : vector<8x32xf32>
    %99 = tpu.matmul %97, %98, %cst_35 {dimension_numbers = #tpu.dot_dimension_numbers<[1], [0], [0], [1], [0, 0, 1, 1], [], []>} : vector<8x32xbf16>, vector<32x32xbf16>, vector<8x32xf32> -> vector<8x32xf32>
    %c0_36 = arith.constant 0 : index
    %c0_37 = arith.constant 0 : index
    %100 = vector.load %arg5[%c0_36, %c0_37] : memref<1x32xf32, #tpu.memory_space<vmem>>, vector<1x32xf32>
    %101 = vector.broadcast %100 : vector<1x32xf32> to vector<8x32xf32>
    %102 = arith.addf %99, %101 : vector<8x32xf32>
    %103 = arith.addf %1, %102 : vector<8x32xf32>
    %c0_38 = arith.constant 0 : index
    %c0_39 = arith.constant 0 : index
    %104 = vector.load %arg6[%c0_38, %c0_39] : memref<1x32xf32, #tpu.memory_space<vmem>>, vector<1x32xf32>
    %c0_40 = arith.constant 0 : index
    %c0_41 = arith.constant 0 : index
    %105 = vector.load %arg7[%c0_40, %c0_41] : memref<1x32xf32, #tpu.memory_space<vmem>>, vector<1x32xf32>
    %cst_42 = arith.constant dense<0.000000e+00> : vector<8xf32>
    %106 = vector.multi_reduction <add>, %103, %cst_42 [1] : vector<8x32xf32> to vector<8xf32>
    %107 = vector.shape_cast %106 : vector<8xf32> to vector<8x1xf32>
    %cst_43 = arith.constant 3.200000e+01 : f32
    %108 = vector.broadcast %cst_43 : f32 to vector<8x1xf32>
    %109 = arith.divf %107, %108 : vector<8x1xf32>
    %110 = vector.broadcast %109 : vector<8x1xf32> to vector<8x32xf32>
    %111 = arith.subf %103, %110 : vector<8x32xf32>
    %112 = vector.broadcast %109 : vector<8x1xf32> to vector<8x32xf32>
    %113 = arith.subf %103, %112 : vector<8x32xf32>
    %114 = arith.mulf %111, %113 : vector<8x32xf32>
    %cst_44 = arith.constant dense<0.000000e+00> : vector<8xf32>
    %115 = vector.multi_reduction <add>, %114, %cst_44 [1] : vector<8x32xf32> to vector<8xf32>
    %116 = vector.shape_cast %115 : vector<8xf32> to vector<8x1xf32>
    %cst_45 = arith.constant 3.200000e+01 : f32
    %117 = vector.broadcast %cst_45 : f32 to vector<8x1xf32>
    %118 = arith.divf %116, %117 : vector<8x1xf32>
    %119 = vector.broadcast %109 : vector<8x1xf32> to vector<8x32xf32>
    %120 = arith.subf %103, %119 : vector<8x32xf32>
    %cst_46 = arith.constant 9.99999974E-6 : f32
    %121 = vector.broadcast %cst_46 : f32 to vector<8x1xf32>
    %122 = arith.addf %118, %121 : vector<8x1xf32>
    %123 = math.rsqrt %122 : vector<8x1xf32>
    %124 = vector.broadcast %123 : vector<8x1xf32> to vector<8x32xf32>
    %125 = arith.mulf %120, %124 : vector<8x32xf32>
    %126 = vector.broadcast %104 : vector<1x32xf32> to vector<8x32xf32>
    %127 = arith.mulf %125, %126 : vector<8x32xf32>
    %128 = vector.broadcast %105 : vector<1x32xf32> to vector<8x32xf32>
    %129 = arith.addf %127, %128 : vector<8x32xf32>
    %130 = arith.truncf %129 : vector<8x32xf32> to vector<8x32xbf16>
    %c0_47 = arith.constant 0 : index
    %c0_48 = arith.constant 0 : index
    %131 = vector.load %arg8[%c0_47, %c0_48] : memref<32x64xbf16, #tpu.memory_space<vmem>>, vector<32x64xbf16>
    %cst_49 = arith.constant dense<0.000000e+00> : vector<8x64xf32>
    %132 = tpu.matmul %130, %131, %cst_49 {dimension_numbers = #tpu.dot_dimension_numbers<[1], [0], [0], [1], [0, 0, 1, 1], [], []>} : vector<8x32xbf16>, vector<32x64xbf16>, vector<8x64xf32> -> vector<8x64xf32>
    %c0_50 = arith.constant 0 : index
    %c0_51 = arith.constant 0 : index
    %133 = vector.load %arg9[%c0_50, %c0_51] : memref<1x64xf32, #tpu.memory_space<vmem>>, vector<1x64xf32>
    %134 = vector.broadcast %133 : vector<1x64xf32> to vector<8x64xf32>
    %135 = arith.addf %132, %134 : vector<8x64xf32>
    %cst_52 = arith.constant 0.000000e+00 : f32
    %136 = vector.broadcast %cst_52 : f32 to vector<8x64xf32>
    %137 = arith.maximumf %135, %136 : vector<8x64xf32>
    %138 = arith.truncf %137 : vector<8x64xf32> to vector<8x64xbf16>
    %c0_53 = arith.constant 0 : index
    %c0_54 = arith.constant 0 : index
    %139 = vector.load %arg10[%c0_53, %c0_54] : memref<64x32xbf16, #tpu.memory_space<vmem>>, vector<64x32xbf16>
    %cst_55 = arith.constant dense<0.000000e+00> : vector<8x32xf32>
    %140 = tpu.matmul %138, %139, %cst_55 {dimension_numbers = #tpu.dot_dimension_numbers<[1], [0], [0], [1], [0, 0, 1, 1], [], []>} : vector<8x64xbf16>, vector<64x32xbf16>, vector<8x32xf32> -> vector<8x32xf32>
    %c0_56 = arith.constant 0 : index
    %c0_57 = arith.constant 0 : index
    %141 = vector.load %arg11[%c0_56, %c0_57] : memref<1x32xf32, #tpu.memory_space<vmem>>, vector<1x32xf32>
    %142 = vector.broadcast %141 : vector<1x32xf32> to vector<8x32xf32>
    %143 = arith.addf %140, %142 : vector<8x32xf32>
    %144 = arith.addf %129, %143 : vector<8x32xf32>
    %c0_58 = arith.constant 0 : index
    %c0_59 = arith.constant 0 : index
    %145 = vector.load %arg12[%c0_58, %c0_59] : memref<1x32xf32, #tpu.memory_space<vmem>>, vector<1x32xf32>
    %c0_60 = arith.constant 0 : index
    %c0_61 = arith.constant 0 : index
    %146 = vector.load %arg13[%c0_60, %c0_61] : memref<1x32xf32, #tpu.memory_space<vmem>>, vector<1x32xf32>
    %cst_62 = arith.constant dense<0.000000e+00> : vector<8xf32>
    %147 = vector.multi_reduction <add>, %144, %cst_62 [1] : vector<8x32xf32> to vector<8xf32>
    %148 = vector.shape_cast %147 : vector<8xf32> to vector<8x1xf32>
    %cst_63 = arith.constant 3.200000e+01 : f32
    %149 = vector.broadcast %cst_63 : f32 to vector<8x1xf32>
    %150 = arith.divf %148, %149 : vector<8x1xf32>
    %151 = vector.broadcast %150 : vector<8x1xf32> to vector<8x32xf32>
    %152 = arith.subf %144, %151 : vector<8x32xf32>
    %153 = vector.broadcast %150 : vector<8x1xf32> to vector<8x32xf32>
    %154 = arith.subf %144, %153 : vector<8x32xf32>
    %155 = arith.mulf %152, %154 : vector<8x32xf32>
    %cst_64 = arith.constant dense<0.000000e+00> : vector<8xf32>
    %156 = vector.multi_reduction <add>, %155, %cst_64 [1] : vector<8x32xf32> to vector<8xf32>
    %157 = vector.shape_cast %156 : vector<8xf32> to vector<8x1xf32>
    %cst_65 = arith.constant 3.200000e+01 : f32
    %158 = vector.broadcast %cst_65 : f32 to vector<8x1xf32>
    %159 = arith.divf %157, %158 : vector<8x1xf32>
    %160 = vector.broadcast %150 : vector<8x1xf32> to vector<8x32xf32>
    %161 = arith.subf %144, %160 : vector<8x32xf32>
    %cst_66 = arith.constant 9.99999974E-6 : f32
    %162 = vector.broadcast %cst_66 : f32 to vector<8x1xf32>
    %163 = arith.addf %159, %162 : vector<8x1xf32>
    %164 = math.rsqrt %163 : vector<8x1xf32>
    %165 = vector.broadcast %164 : vector<8x1xf32> to vector<8x32xf32>
    %166 = arith.mulf %161, %165 : vector<8x32xf32>
    %167 = vector.broadcast %145 : vector<1x32xf32> to vector<8x32xf32>
    %168 = arith.mulf %166, %167 : vector<8x32xf32>
    %169 = vector.broadcast %146 : vector<1x32xf32> to vector<8x32xf32>
    %170 = arith.addf %168, %169 : vector<8x32xf32>
    %c0_67 = arith.constant 0 : index
    %c0_68 = arith.constant 0 : index
    %c0_69 = arith.constant 0 : index
    %171 = vector.load %arg14[%c0_67, %c0_68, %c0_69] : memref<1x8x32xf32, #tpu.memory_space<vmem>>, vector<1x8x32xf32>
    %172 = vector.shape_cast %171 : vector<1x8x32xf32> to vector<8x32xf32>
    %173 = vector.shape_cast %170 : vector<8x32xf32> to vector<1x8x32xf32>
    tpu.vector_store %arg14[%c0_67, %c0_68, %c0_69], %173 {strides = array<i32>} : memref<1x8x32xf32, #tpu.memory_space<vmem>>, vector<1x8x32xf32>,
    return
  }
  func.func @transform_0(%arg0: i32) -> (i32, i32, i32) {
    %c0_i32 = arith.constant 0 : i32
    %c0_i32_0 = arith.constant 0 : i32
    %c0_i32_1 = arith.constant 0 : i32
    return %arg0, %c0_i32, %c0_i32_0 : i32, i32, i32
  }
  func.func @transform_1(%arg0: i32) -> (i32, i32) {
    %c0_i32 = arith.constant 0 : i32
    %c0_i32_0 = arith.constant 0 : i32
    %c0_i32_1 = arith.constant 0 : i32
    return %c0_i32, %c0_i32_0 : i32, i32
  }
  func.func @transform_2(%arg0: i32) -> (i32, i32) {
    %c0_i32 = arith.constant 0 : i32
    %c0_i32_0 = arith.constant 0 : i32
    %c0_i32_1 = arith.constant 0 : i32
    return %c0_i32, %c0_i32_0 : i32, i32
  }
  func.func @transform_3(%arg0: i32) -> (i32, i32) {
    %c0_i32 = arith.constant 0 : i32
    %c0_i32_0 = arith.constant 0 : i32
    %c0_i32_1 = arith.constant 0 : i32
    return %c0_i32, %c0_i32_0 : i32, i32
  }
  func.func @transform_4(%arg0: i32) -> (i32, i32) {
    %c0_i32 = arith.constant 0 : i32
    %c0_i32_0 = arith.constant 0 : i32
    %c0_i32_1 = arith.constant 0 : i32
    return %c0_i32, %c0_i32_0 : i32, i32
  }
  func.func @transform_5(%arg0: i32) -> (i32, i32) {
    %c0_i32 = arith.constant 0 : i32
    %c0_i32_0 = arith.constant 0 : i32
    %c0_i32_1 = arith.constant 0 : i32
    return %c0_i32, %c0_i32_0 : i32, i32
  }
  func.func @transform_6(%arg0: i32) -> (i32, i32) {
    %c0_i32 = arith.constant 0 : i32
    %c0_i32_0 = arith.constant 0 : i32
    %c0_i32_1 = arith.constant 0 : i32
    return %c0_i32, %c0_i32_0 : i32, i32
  }
  func.func @transform_7(%arg0: i32) -> (i32, i32) {
    %c0_i32 = arith.constant 0 : i32
    %c0_i32_0 = arith.constant 0 : i32
    %c0_i32_1 = arith.constant 0 : i32
    return %c0_i32, %c0_i32_0 : i32, i32
  }
  func.func @transform_8(%arg0: i32) -> (i32, i32) {
    %c0_i32 = arith.constant 0 : i32
    %c0_i32_0 = arith.constant 0 : i32
    %c0_i32_1 = arith.constant 0 : i32
    return %c0_i32, %c0_i32_0 : i32, i32
  }
  func.func @transform_9(%arg0: i32) -> (i32, i32) {
    %c0_i32 = arith.constant 0 : i32
    %c0_i32_0 = arith.constant 0 : i32
    %c0_i32_1 = arith.constant 0 : i32
    return %c0_i32, %c0_i32_0 : i32, i32
  }
  func.func @transform_10(%arg0: i32) -> (i32, i32) {
    %c0_i32 = arith.constant 0 : i32
    %c0_i32_0 = arith.constant 0 : i32
    %c0_i32_1 = arith.constant 0 : i32
    return %c0_i32, %c0_i32_0 : i32, i32
  }
  func.func @transform_11(%arg0: i32) -> (i32, i32) {
    %c0_i32 = arith.constant 0 : i32
    %c0_i32_0 = arith.constant 0 : i32
    %c0_i32_1 = arith.constant 0 : i32
    return %c0_i32, %c0_i32_0 : i32, i32
  }
  func.func @transform_12(%arg0: i32) -> (i32, i32) {
    %c0_i32 = arith.constant 0 : i32
    %c0_i32_0 = arith.constant 0 : i32
    %c0_i32_1 = arith.constant 0 : i32
    return %c0_i32, %c0_i32_0 : i32, i32
  }
  func.func @transform_13(%arg0: i32) -> (i32, i32, i32) {
    %c0_i32 = arith.constant 0 : i32
    %c0_i32_0 = arith.constant 0 : i32
    %c0_i32_1 = arith.constant 0 : i32
    return %arg0, %c0_i32, %c0_i32_0 : i32, i32, i32
  }
}

module attributes {stable_mosaic.version = 11 : i64} {
  func.func @_revert_loss_kernel(%arg0: i32, %arg1: memref<1x8x32xf32, #tpu.memory_space<vmem>>, %arg2: memref<1x8x16xf32, #tpu.memory_space<vmem>>, %arg3: memref<1x8x1xf32, #tpu.memory_space<vmem>>, %arg4: memref<32x16xbf16, #tpu.memory_space<vmem>>, %arg5: memref<1x16xf32, #tpu.memory_space<vmem>>, %arg6: memref<1x8x16xf32, #tpu.memory_space<vmem>>, %arg7: memref<1x1x1xf32, #tpu.memory_space<vmem>>, %arg8: memref<1x1x1xf32, #tpu.memory_space<vmem>>) attributes {dimension_semantics = [#tpu.dimension_semantics<parallel>], iteration_bounds = array<i64: 2>, scalar_prefetch = 0 : i64, scratch_operands = 0 : i64, tpu.core_type = #tpu.core_type<tc>, window_params = [{transform_indices = @transform_0, window_bounds = array<i64: 1, 8, 32>}, {transform_indices = @transform_1, window_bounds = array<i64: 1, 8, 16>}, {transform_indices = @transform_2, window_bounds = array<i64: 1, 8, 1>}, {pipeline_mode = #tpu.pipeline_mode<synchronous>, transform_indices = @transform_3, window_bounds = array<i64: 32, 16>}, {pipeline_mode = #tpu.pipeline_mode<synchronous>, transform_indices = @transform_4, window_bounds = array<i64: 1, 16>}, {transform_indices = @transform_5, window_bounds = array<i64: 1, 8, 16>}, {transform_indices = @transform_6, window_bounds = array<i64: 1, 1, 1>}, {transform_indices = @transform_7, window_bounds = array<i64: 1, 1, 1>}]} {
    %c0 = arith.constant 0 : index
    %c0_0 = arith.constant 0 : index
    %c0_1 = arith.constant 0 : index
    %0 = vector.load %arg1[%c0, %c0_0, %c0_1] : memref<1x8x32xf32, #tpu.memory_space<vmem>>, vector<1x8x32xf32>
    %1 = vector.shape_cast %0 : vector<1x8x32xf32> to vector<8x32xf32>
    %2 = arith.truncf %1 : vector<8x32xf32> to vector<8x32xbf16>
    %c0_2 = arith.constant 0 : index
    %c0_3 = arith.constant 0 : index
    %3 = vector.load %arg4[%c0_2, %c0_3] : memref<32x16xbf16, #tpu.memory_space<vmem>>, vector<32x16xbf16>
    %cst = arith.constant dense<0.000000e+00> : vector<8x16xf32>
    %4 = tpu.matmul %2, %3, %cst {dimension_numbers = #tpu.dot_dimension_numbers<[1], [0], [0], [1], [0, 0, 1, 1], [], []>} : vector<8x32xbf16>, vector<32x16xbf16>, vector<8x16xf32> -> vector<8x16xf32>
    %c0_4 = arith.constant 0 : index
    %c0_5 = arith.constant 0 : index
    %5 = vector.load %arg5[%c0_4, %c0_5] : memref<1x16xf32, #tpu.memory_space<vmem>>, vector<1x16xf32>
    %6 = vector.broadcast %5 : vector<1x16xf32> to vector<8x16xf32>
    %7 = arith.addf %4, %6 : vector<8x16xf32>
    %c0_6 = arith.constant 0 : index
    %c0_7 = arith.constant 0 : index
    %c0_8 = arith.constant 0 : index
    %8 = vector.load %arg6[%c0_6, %c0_7, %c0_8] : memref<1x8x16xf32, #tpu.memory_space<vmem>>, vector<1x8x16xf32>
    %9 = vector.shape_cast %8 : vector<1x8x16xf32> to vector<8x16xf32>
    %10 = vector.shape_cast %7 : vector<8x16xf32> to vector<1x8x16xf32>
    tpu.vector_store %arg6[%c0_6, %c0_7, %c0_8], %10 {strides = array<i32>} : memref<1x8x16xf32, #tpu.memory_space<vmem>>, vector<1x8x16xf32>,
    %c0_9 = arith.constant 0 : index
    %c0_10 = arith.constant 0 : index
    %c0_11 = arith.constant 0 : index
    %11 = vector.load %arg3[%c0_9, %c0_10, %c0_11] : memref<1x8x1xf32, #tpu.memory_space<vmem>>, vector<1x8x1xf32>
    %12 = vector.shape_cast %11 : vector<1x8x1xf32> to vector<8x1xf32>
    %c0_12 = arith.constant 0 : index
    %c0_13 = arith.constant 0 : index
    %c0_14 = arith.constant 0 : index
    %13 = vector.load %arg2[%c0_12, %c0_13, %c0_14] : memref<1x8x16xf32, #tpu.memory_space<vmem>>, vector<1x8x16xf32>
    %14 = vector.shape_cast %13 : vector<1x8x16xf32> to vector<8x16xf32>
    %15 = arith.subf %7, %14 : vector<8x16xf32>
    %16 = vector.broadcast %12 : vector<8x1xf32> to vector<8x16xf32>
    %17 = arith.mulf %15, %16 : vector<8x16xf32>
    %18 = arith.mulf %17, %17 : vector<8x16xf32>
    %19 = vector.shape_cast %18 : vector<8x16xf32> to vector<1x8x16xf32>
    %cst_15 = arith.constant dense<0.000000e+00> : vector<1xf32>
    %20 = vector.multi_reduction <add>, %19, %cst_15 [1, 2] : vector<1x8x16xf32> to vector<1xf32>
    %21 = vector.shape_cast %20 : vector<1xf32> to vector<1x1x1xf32>
    %22 = vector.extract %21[0, 0, 0] : f32 from vector<1x1x1xf32>
    %23 = vector.broadcast %22 : f32 to vector<1x1x1xf32>
    %c0_16 = arith.constant 0 : index
    %c0_17 = arith.constant 0 : index
    %c0_18 = arith.constant 0 : index
    %24 = vector.load %arg7[%c0_16, %c0_17, %c0_18] : memref<1x1x1xf32, #tpu.memory_space<vmem>>, vector<1x1x1xf32>
    tpu.vector_store %arg7[%c0_16, %c0_17, %c0_18], %23 {strides = array<i32>} : memref<1x1x1xf32, #tpu.memory_space<vmem>>, vector<1x1x1xf32>,
    %25 = vector.shape_cast %12 : vector<8x1xf32> to vector<1x8x1xf32>
    %cst_19 = arith.constant dense<0.000000e+00> : vector<1xf32>
    %26 = vector.multi_reduction <add>, %25, %cst_19 [1, 2] : vector<1x8x1xf32> to vector<1xf32>
    %27 = vector.shape_cast %26 : vector<1xf32> to vector<1x1x1xf32>
    %28 = vector.extract %27[0, 0, 0] : f32 from vector<1x1x1xf32>
    %29 = vector.broadcast %28 : f32 to vector<1x1x1xf32>
    %c0_20 = arith.constant 0 : index
    %c0_21 = arith.constant 0 : index
    %c0_22 = arith.constant 0 : index
    %30 = vector.load %arg8[%c0_20, %c0_21, %c0_22] : memref<1x1x1xf32, #tpu.memory_space<vmem>>, vector<1x1x1xf32>
    tpu.vector_store %arg8[%c0_20, %c0_21, %c0_22], %29 {strides = array<i32>} : memref<1x1x1xf32, #tpu.memory_space<vmem>>, vector<1x1x1xf32>,
    return
  }
  func.func @transform_0(%arg0: i32) -> (i32, i32, i32) {
    %c0_i32 = arith.constant 0 : i32
    %c0_i32_0 = arith.constant 0 : i32
    %c0_i32_1 = arith.constant 0 : i32
    return %arg0, %c0_i32, %c0_i32_0 : i32, i32, i32
  }
  func.func @transform_1(%arg0: i32) -> (i32, i32, i32) {
    %c0_i32 = arith.constant 0 : i32
    %c0_i32_0 = arith.constant 0 : i32
    %c0_i32_1 = arith.constant 0 : i32
    return %arg0, %c0_i32, %c0_i32_0 : i32, i32, i32
  }
  func.func @transform_2(%arg0: i32) -> (i32, i32, i32) {
    %c0_i32 = arith.constant 0 : i32
    %c0_i32_0 = arith.constant 0 : i32
    %c0_i32_1 = arith.constant 0 : i32
    return %arg0, %c0_i32, %c0_i32_0 : i32, i32, i32
  }
  func.func @transform_3(%arg0: i32) -> (i32, i32) {
    %c0_i32 = arith.constant 0 : i32
    %c0_i32_0 = arith.constant 0 : i32
    %c0_i32_1 = arith.constant 0 : i32
    return %c0_i32, %c0_i32_0 : i32, i32
  }
  func.func @transform_4(%arg0: i32) -> (i32, i32) {
    %c0_i32 = arith.constant 0 : i32
    %c0_i32_0 = arith.constant 0 : i32
    %c0_i32_1 = arith.constant 0 : i32
    return %c0_i32, %c0_i32_0 : i32, i32
  }
  func.func @transform_5(%arg0: i32) -> (i32, i32, i32) {
    %c0_i32 = arith.constant 0 : i32
    %c0_i32_0 = arith.constant 0 : i32
    %c0_i32_1 = arith.constant 0 : i32
    return %arg0, %c0_i32, %c0_i32_0 : i32, i32, i32
  }
  func.func @transform_6(%arg0: i32) -> (i32, i32, i32) {
    %c0_i32 = arith.constant 0 : i32
    %c0_i32_0 = arith.constant 0 : i32
    %c0_i32_1 = arith.constant 0 : i32
    return %arg0, %c0_i32, %c0_i32_0 : i32, i32, i32
  }
  func.func @transform_7(%arg0: i32) -> (i32, i32, i32) {
    %c0_i32 = arith.constant 0 : i32
    %c0_i32_0 = arith.constant 0 : i32
    %c0_i32_1 = arith.constant 0 : i32
    return %arg0, %c0_i32, %c0_i32_0 : i32, i32, i32
  }
}

</mosaic_0001>

<bundles_post_ra>
// kernel: simple_transformer_forward.4
= control target key start
LH: loop header
LB: loop body
LE: loop exit
PB: predicated region body
PF: predicated region fallthrough
CT: control target
= control target key end

     0   :  { %s344_s12 = smov 0   ;;  %s367_s0 = inlined_call_operand.vmem [shape: f32[2,8,16], index: 0, kind: input, shape index: {}]   ;;  %s368_s1 = inlined_call_operand.vmem [shape: bf16[16,32], index: 1, kind: input, shape index: {}]   ;;  %s369_s2 = inlined_call_operand.vmem [shape: f32[1,32], index: 2, kind: input, shape index: {}]   ;;  %s370_s3 = inlined_call_operand.vmem [shape: f32[2,8,32], index: 3, kind: output, shape index: {}]  }
   0x1 LB: > { %s283_s13 = sadd.s32 4294967295, %s320_s12   ;;  %p287_p0 = scmp.ge.s32.totalorder %s320_s12, 1  ;;  %s320_s12 = sphi %s344_s12, %s13_s12  }
   0x2   : > { %p136_p1 = scmp.lt.s32.totalorder %s320_s12, 3 }
   0x4   : > { %p137_p2 = pnand %p287_p0, %p136_p1 }
   0x5   : > { %v313_v0 = vld [vmem:[%s368_s1] sm:$0xff] (!%p137_p2)   ;;  %v322_v1 = vmov (!%p137_p2), 0.0   ;;  %p158_p3 = scmp.lt.s32.totalorder (!%p137_p2), %s283_s13, 1  ;;  %vm323_vm0 = vmmov (!%p137_p2), 0   ;;  %vm184_vm1 = vcmask (!%p137_p2), 130048   ;;  %vm228_vm2 = vcmask (!%p137_p2), 261120  }
   0x6   : > { %140 = sbr.rel (%p137_p2) target bundleno = 234 (0xea), region = 32  ;;  %297 = vmatprep.subr.bf16.mxu0 (!%p137_p2), %v322_v1  ;;  %299 = vmatprep.mubr.msk.bf16.mxu0 (!%p137_p2), %vm323_vm0, %v322_v1  ;;  %v290_v4 = vld [vmem:[%s369_s2] ss:$0 sm:$0xff] (!%p137_p2) }
   0x7   : > { %298 = vmatpush3.bf16.msra.mxu0 (!%p137_p2), %v313_v0 }
   0xd   : > { %s372_s13 = smov (!%p158_p3, %s283_s13), 1 }
   0xe   : > { %s288_s16 = sshll.u32 %s372_s13, 3 }
   0xf   : > { %s161_s19 = scalar_lea.vmem %s367_s0, %s288_s16  ;;  %s165_s24 = scalar_lea.vmem %s370_s3, %s288_s16 }
  0x10   : > { %v167_v2 = vld [vmem:[%s161_s19] sm:$0xff] }
  0x11   : > { %v168_v3 = vpack.c.bf16 %v167_v2, %v167_v2 }
  0x13   : > { %300 = vmatmul.mubr.msk.bf16.vlgmr.msra.gmra.mrb[0].mxu0 %vm184_vm1, %v168_v3 }
  0xe6   : > { %v222_v5 = vpop.f32.mrb[0].mxu0 }
  0xe7   : > { %v223_v6 = vadd.f32 %v290_v4, %v222_v5  ;;  %v301_v7 = vpop.f32.mrb[1].mxu0 }
  0xe8   : > { %v225_v8 = vpop.f32.mrb[2].mxu0 }
  0xe9   : > { %229 = vst.msk [vmem:[%s165_s24] sm:$0xff] %vm228_vm2, %v223_v6  ;;  %v302_v9 = vpop.f32.mrb[3].mxu0 }
  0xea PF: > { %s13_s12 = sadd.s32 1, %s320_s12  }
  0xeb   : > { %p10_p4 = scmp.ge.s32.totalorder %s13_s12, 4  }
  0xed   :  { %12 = sbr.rel (!%p10_p4) target bundleno = 1 (0x1), region = 62 }

// kernel: simple_transformer_forward.5
= control target key start
LH: loop header
LB: loop body
LE: loop exit
PB: predicated region body
PF: predicated region fallthrough
CT: control target
= control target key end

     0   :  { %s1607_s25 = smov 0   ;;  %s1779_s0 = inlined_call_operand.vmem [shape: f32[2,8,32], index: 0, kind: input, shape index: {}]   ;;  %s1780_s1 = inlined_call_operand.vmem [shape: bf16[32,96], index: 1, kind: input, shape index: {}]   ;;  %s1781_s2 = inlined_call_operand.vmem [shape: f32[1,96], index: 2, kind: input, shape index: {}]   ;;  %s1782_s3 = inlined_call_operand.vmem [shape: bf16[32,32], index: 3, kind: input, shape index: {}]   ;;  %s1783_s4 = inlined_call_operand.vmem [shape: f32[1,32], index: 4, kind: input, shape index: {}]   ;;  %s1784_s5 = inlined_call_operand.vmem [shape: f32[1,32], index: 5, kind: input, shape index: {}]   ;;  %s1785_s6 = inlined_call_operand.vmem [shape: f32[1,32], index: 6, kind: input, shape index: {}]   ;;  %s1786_s7 = inlined_call_operand.vmem [shape: bf16[32,64], index: 7, kind: input, shape index: {}]   ;;  %s1787_s8 = inlined_call_operand.vmem [shape: f32[1,64], index: 8, kind: input, shape index: {}]   ;;  %s1788_s9 = inlined_call_operand.vmem [shape: bf16[64,32], index: 9, kind: input, shape index: {}]   ;;  %s1789_s10 = inlined_call_operand.vmem [shape: f32[1,32], index: 10, kind: input, shape index: {}]   ;;  %s1790_s11 = inlined_call_operand.vmem [shape: f32[1,32], index: 11, kind: input, shape index: {}]   ;;  %s1791_s12 = inlined_call_operand.vmem [shape: f32[1,32], index: 12, kind: input, shape index: {}]   ;;  %s1792_s13 = inlined_call_operand.vmem [shape: f32[2,8,32], index: 13, kind: output, shape index: {}]  }
   0x1 LB: > { %s1306_s26 = sadd.s32 4294967295, %s1519_s25   ;;  %p1310_p0 = scmp.ge.s32.totalorder %s1519_s25, 1  ;;  %s1519_s25 = sphi %s1607_s25, %s23_s25  }
   0x2   : > { %p386_p1 = scmp.lt.s32.totalorder %s1519_s25, 3 }
   0x4   : > { %p387_p2 = pnand %p1310_p0, %p386_p1 }
   0x5   : > { %v1483_v0 = vld [vmem:[%s1780_s1] sm:$0xff] (!%p387_p2)   ;;  %v1521_v1 = vmov (!%p387_p2), 0.0   ;;  %v1484_v2 = vld [vmem:[%s1780_s1 + $0x8] sm:$0xff] (!%p387_p2)   ;;  %vm1522_vm0 = vmmov (!%p387_p2), 0   ;;  %p428_p3 = scmp.lt.s32.totalorder (!%p387_p2), %s1306_s26, 1  ;;  %vm462_vm1 = vcmask (!%p387_p2), 261120  }
   0x6   : > { %390 = sbr.rel (%p387_p2) target bundleno = 2566 (0xa06), region = 72  ;;  %1375 = vmatprep.subr.bf16.mxu0 (!%p387_p2), %v1521_v1  ;;  %1383 = vmatprep.subr.bf16.mxu1 (!%p387_p2), %v1521_v1  ;;  %v1313_v5 = vld [vmem:[%s1781_s2] ss:$0 sm:$0xff] (!%p387_p2)  ;;  %s1523_s20 = smov (!%p387_p2), 120   ;;  %vm510_vm2 = vcmask (!%p387_p2), 64512   ;;  %vm575_vm3 = vcmask (!%p387_p2), 1043456  }
   0x7   : > { %1376 = vmatpush3.bf16.msra.mxu0 (!%p387_p2), %v1483_v0  ;;  %1379 = vmatprep.mubr.msk.bf16.mxu0 (!%p387_p2), %vm1522_vm0, %v1521_v1  ;;  %s1524_s21 = smov (!%p387_p2), 96   ;;  %s1525_s22 = smov (!%p387_p2), 80   ;;  %vm735_vm4 = vcmask (!%p387_p2), 130112   ;;  %vm852_vm5 = vcmask (!%p387_p2), 195712   ;;  %vm969_vm6 = vcmask (!%p387_p2), 261312   ;;  %vm1178_vm7 = vcmask (!%p387_p2), 523264  }
   0x8   : > { %1377 = vmatprep.subr.bf16.mxu0 (!%p387_p2), %v1521_v1  ;;  %1385 = vmatprep.mubr.msk.bf16.mxu1 (!%p387_p2), %vm1522_vm0, %v1521_v1  ;;  %s1526_s23 = smov (!%p387_p2), 88   ;;  %s1527_s24 = smov (!%p387_p2), 72  }
   0x9   : > { %s1528_s27 = smov (!%p387_p2), 112   ;;  %s1529_s28 = smov (!%p387_p2), 104  }
   0xa   : > { %s1530_s29 = smov (!%p387_p2), 56   ;;  %s1531_s30 = smov (!%p387_p2), 64  }
   0xb   : > { %1378 = vmatpush3.bf16.msra.mxu0 (!%p387_p2), %v1484_v2  ;;  %s1532_s15 = smov (!%p387_p2), 40   ;;  %s1533_s16 = smov (!%p387_p2), 48  }
   0xc   : > { %1389 = vmatprep.subr.bf16.mxu0 (!%p387_p2), %v1521_v1 }
   0xd   : > { %s1794_s26 = smov (!%p428_p3, %s1306_s26), 1 }
   0xe   : > { %s1311_s14 = sshll.u32 %s1794_s26, 3 }
   0xf   : > { %s431_s17 = scalar_lea.vmem %s1779_s0, %s1311_s14 }
  0x10   : > { %v1637_v3 = vld [vmem:[%s431_s17] sm:$0xff]  ;;  %s1534_s17 = smov 8  }
  0x11   : > { %v438_v4 = vpack.c.bf16 %v1637_v3, %v1637_v3 }
  0x13   : > { %1380 = vmatmul.mubr.msk.bf16.vlgmr.msra.gmra.mrb[0].mxu0 %vm462_vm1, %v438_v4 }
  0x14   : > { %1391 = vmatprep.mubr.msk.bf16.mxu0 %vm1522_vm0, %v1521_v1 }
  0xe6   : > { %v500_v6 = vpop.f32.mrb[0].mxu0 }
  0xe7   : > { %v501_v7 = vadd.f32 %v1313_v5, %v500_v6  ;;  %v1381_v8 = vpop.f32.mrb[1].mxu0 }
  0xe8   : > { %v503_v9 = vpop.f32.mrb[2].mxu0 }
  0xe9   : > { %v1647_v10 = vpack.c.bf16 %v501_v7, %v501_v7  ;;  %v1382_v11 = vpop.f32.mrb[3].mxu0 }
  0xeb   : > { %620 = vrot.lane.b32.xlu1 %v1647_v10, %s1523_s20  ;;  %508 = vrot.lane.b32.xlu0 %v1647_v10, %s1524_s21 }
  0xef   : > { %739 = vrot.lane.b32.xlu1 %v1647_v10, %s1525_s22  ;;  %622 = vrot.lane.b32.xlu0 %v1647_v10, %s1526_s23  ;;  %s1535_s22 = smov 16   ;;  %s1536_s23 = smov 24  }
  0xf3   : > { %856 = vrot.lane.b32.xlu1 %v1647_v10, %s1527_s24  ;;  %737 = vrot.lane.b32.xlu0 %v1647_v10, %s1528_s27  ;;  %s435_s24 = scalar_lea.vmem %s1792_s13, %s1311_s14 }
  0xf7   : > { %854 = vrot.lane.b32.xlu0 %v1647_v10, %s1529_s28 }
 0x15d   : > { %v509_v12 = vpop.permute.xlu0 %508  ;;  %v621_v15 = vpop.permute.xlu1 %620 }
 0x15e   : > { %v515_v13 = vsel %vm510_vm2, %v509_v12, 0 }
 0x15f   : > { %1384 = vmatpush3.bf16.xpose.msra.mxu1 %v515_v13 }
 0x160   : > { %1395 = vmatprep.subr.bf16.mxu1 %v1521_v1 }
 0x161   : > { %v623_v14 = vpop.permute.xlu0 %622  ;;  %v740_v17 = vpop.permute.xlu1 %739 }
 0x162   : > { %v628_v16 = vsel %vm510_vm2, %v623_v14, 0  ;;  %v745_v18 = vsel %vm510_vm2, %v740_v17, 0 }
 0x165   : > { %v857_v19 = vpop.permute.xlu1 %856  ;;  %v738_v20 = vpop.permute.xlu0 %737 }
 0x166   : > { %1386 = vmatmul.mubr.msk.bf16.vlgmr.msra.gmra.mrb[0].mxu1 %vm510_vm2, %v1647_v10  ;;  %v862_v21 = vsel %vm510_vm2, %v857_v19, 0 }
 0x167   : > { %1396 = vmatpush3.bf16.xpose.msra.mxu1 %v628_v16  ;;  %1397 = vmatprep.mubr.msk.bf16.mxu1 %vm1522_vm0, %v1521_v1 }
 0x168   : > { %1407 = vmatprep.subr.bf16.mxu1 %v1521_v1 }
 0x169   : > { %v855_v22 = vpop.permute.xlu0 %854 }
 0x16e   : > { %1398 = vmatmul.mubr.msk.bf16.vlgmr.msra.gmra.mrb[4].mxu1 %vm510_vm2, %v621_v15 }
 0x16f   : > { %1408 = vmatpush3.bf16.xpose.msra.mxu1 %v745_v18  ;;  %1409 = vmatprep.mubr.msk.bf16.mxu1 %vm1522_vm0, %v1521_v1 }
 0x170   : > { %1419 = vmatprep.subr.bf16.mxu1 %v1521_v1 }
 0x176   : > { %1410 = vmatmul.mubr.msk.bf16.vlgmr.msra.gmra.mrb[8].mxu1 %vm510_vm2, %v738_v20 }
 0x177   : > { %1420 = vmatpush3.bf16.xpose.msra.mxu1 %v862_v21  ;;  %1421 = vmatprep.mubr.msk.bf16.mxu1 %vm1522_vm0, %v1521_v1 }
 0x178   : > { %1431 = vmatprep.subr.bf16.mxu1 %v1521_v1 }
 0x17e   : > { %1422 = vmatmul.mubr.msk.bf16.vlgmr.msra.gmra.mrb[12].mxu1 %vm510_vm2, %v855_v22 }
 0x17f   : > { %1435 = vmatprep.mubr.msk.bf16.mxu1 %vm1522_vm0, %v1521_v1 }
 0x239   : > { %v551_v23 = vpop.f32.mrb[0].mxu1 }
 0x23a   : > { %v557_v24 = vmul.f32 0.35355338, %v551_v23  ;;  %v1387_v25 = vpop.f32.mrb[1].mxu1 }
 0x23b   : > { %v554_v26 = vpop.f32.mrb[2].mxu1 }
 0x23c   : > { %v1388_v27 = vpop.f32.mrb[3].mxu1  ;;  %v558_v28 = vsel %vm510_vm2, %v557_v24, -inf }
 0x23d   : > { %559 = vmax.xlane.f32.xlu1 %v558_v28 }
 0x241   : > { %v664_v29 = vpop.f32.mrb[4].mxu1 }
 0x242   : > { %v670_v30 = vmul.f32 0.35355338, %v664_v29  ;;  %v1399_v31 = vpop.f32.mrb[5].mxu1 }
 0x243   : > { %v667_v32 = vpop.f32.mrb[6].mxu1 }
 0x244   : > { %v1400_v33 = vpop.f32.mrb[7].mxu1  ;;  %v671_v34 = vsel %vm510_vm2, %v670_v30, -inf }
 0x245   : > { %672 = vmax.xlane.f32.xlu0 %v671_v34 }
 0x249   : > { %v781_v35 = vpop.f32.mrb[8].mxu1 }
 0x24a   : > { %v787_v36 = vmul.f32 0.35355338, %v781_v35  ;;  %v1411_v37 = vpop.f32.mrb[9].mxu1 }
 0x24b   : > { %v784_v38 = vpop.f32.mrb[10].mxu1  ;;  %v1485_v37 = vld [vmem:[%s1782_s3] sm:$0xff]  }
 0x24c   : > { %v1412_v39 = vpop.f32.mrb[11].mxu1  ;;  %v788_v40 = vsel %vm510_vm2, %v787_v36, -inf  ;;  %1432 = vmatpush3.bf16.msra.mxu1 %v1485_v37  ;;  %v1486_v38 = vld [vmem:[%s1782_s3 + $0x8] sm:$0xff]  }
 0x24d   : > { %789 = vmax.xlane.f32.xlu0 %v788_v40  ;;  %1433 = vmatprep.subr.bf16.mxu1 %v1521_v1 }
 0x250   : > { %1434 = vmatpush3.bf16.msra.mxu1 %v1486_v38 }
 0x251   : > { %v898_v41 = vpop.f32.mrb[12].mxu1  ;;  %1447 = vmatprep.subr.bf16.mxu1 %v1521_v1 }
 0x252   : > { %v904_v42 = vmul.f32 0.35355338, %v898_v41  ;;  %v1423_v43 = vpop.f32.mrb[13].mxu1 }
 0x253   : > { %v901_v44 = vpop.f32.mrb[14].mxu1 }
 0x254   : > { %v1424_v45 = vpop.f32.mrb[15].mxu1  ;;  %v905_v46 = vsel %vm510_vm2, %v904_v42, -inf }
 0x255   : > { %906 = vmax.xlane.f32.xlu1 %v905_v46 }
 0x2ca   : > { %v560_v47 = vpop.xlane.xlu1 %559 }
 0x2cb   : > { %v561_v48 = vsub.f32 %v557_v24, %v560_v47 }
 0x2cd   : > { %v562_v49 = vmul.f32 1.442695, %v561_v48 }
 0x2cf   : > { %1493 = vpow2.f32 %v562_v49 }
 0x2d2   : > { %v673_v50 = vpop.xlane.xlu0 %672 }
 0x2d3   : > { %v674_v51 = vsub.f32 %v670_v30, %v673_v50 }
 0x2d5   : > { %v675_v52 = vmul.f32 1.442695, %v674_v51 }
 0x2d7   : > { %1495 = vpow2.f32 %v675_v52  ;;  %v1325_v52 = vld [vmem:[%s1783_s4] ss:$0 sm:$0xff] }
 0x2d9   : > { %v1494_v53 = vpop.eup %1493 }
 0x2da   : > { %v790_v54 = vpop.xlane.xlu0 %789  ;;  %v564_v55 = vsel %vm510_vm2, %v1494_v53, 0.0 }
 0x2db   : > { %v791_v56 = vsub.f32 %v787_v36, %v790_v54  ;;  %565 = vadd.xlane.f32.xlu0 %v564_v55 }
 0x2dd   : > { %v792_v57 = vmul.f32 1.442695, %v791_v56 }
 0x2df   : > { %1497 = vpow2.f32 %v792_v57 }
 0x2e1   : > { %v1496_v58 = vpop.eup %1495 }
 0x2e2   : > { %v677_v59 = vsel %vm510_vm2, %v1496_v58, 0.0  ;;  %v907_v62 = vpop.xlane.xlu1 %906 }
 0x2e3   : > { %678 = vadd.xlane.f32.xlu1 %v677_v59  ;;  %v908_v63 = vsub.f32 %v904_v42, %v907_v62 }
 0x2e5   : > { %v909_v0 = vmul.f32 1.442695, %v908_v63 }
 0x2e7   : > { %1499 = vpow2.f32 %v909_v0 }
 0x2e9   : > { %v1498_v60 = vpop.eup %1497 }
 0x2ea   : > { %v794_v61 = vsel %vm510_vm2, %v1498_v60, 0.0 }
 0x2eb   : > { %795 = vadd.xlane.f32.xlu0 %v794_v61 }
 0x2f1   : > { %v1500_v2 = vpop.eup %1499 }
 0x2f2   : > { %v911_v4 = vsel %vm510_vm2, %v1500_v2, 0.0 }
 0x2f4   : > { %683 = vrot.lane.b32.xlu1 %v1647_v10, %s1530_s29 }
 0x301   : > { %570 = vrot.lane.b32.xlu0 %v1647_v10, %s1531_s30 }
 0x305   : > { %917 = vrot.lane.b32.xlu0 %v1647_v10, %s1532_s15 }
 0x318   : > { %912 = vadd.xlane.f32.xlu1 %v911_v4  ;;  %v1489_v4 = vld [vmem:[%s1788_s9] sm:$0xff]  }
 0x329   : > { %800 = vrot.lane.b32.xlu1 %v1647_v10, %s1533_s16 }
 0x368   : > { %v566_v5 = vpop.xlane.xlu0 %565 }
 0x369   : > { %1501 = vrcp.f32 %v566_v5  ;;  %v1490_v5 = vld [vmem:[%s1788_s9 + $0x8] sm:$0xff]  }
 0x370   : > { %v679_v6 = vpop.xlane.xlu1 %678 }
 0x371   : > { %1503 = vrcp.f32 %v679_v6 }
 0x373   : > { %v1502_v7 = vpop.eup %1501 }
 0x374   : > { %v568_v9 = vmul.f32 %v1502_v7, %v1494_v53  ;;  %v684_v13 = vpop.permute.xlu1 %683 }
 0x375   : > { %v689_v16 = vsel %vm575_vm3, %v684_v13, 0  ;;  %v1330_v13 = vld [vmem:[%s1785_s6] ss:$0 sm:$0xff] }
 0x376   : > { %v569_v14 = vpack.c.bf16 %v568_v9, %v568_v9 }
 0x378   : > { %v796_v8 = vpop.xlane.xlu0 %795 }
 0x379   : > { %1505 = vrcp.f32 %v796_v8 }
 0x37b   : > { %v1504_v15 = vpop.eup %1503 }
 0x37c   : > { %v571_v11 = vpop.permute.xlu0 %570  ;;  %v681_v10 = vmul.f32 %v1504_v15, %v1496_v58 }
 0x37d   : > { %v577_v12 = vsel %vm575_vm3, %v571_v11, 0  ;;  %v1329_v11 = vld [vmem:[%s1784_s5] ss:$0 sm:$0xff] }
 0x37e   : > { %1390 = vmatpush3.bf16.msra.mxu0 %v577_v12  ;;  %v682_v17 = vpack.c.bf16 %v681_v10, %v681_v10  ;;  %v1491_v10 = vld [vmem:[%s1788_s9 + $0x10] sm:$0xff]  }
 0x37f   : > { %1401 = vmatprep.subr.bf16.mxu0 %v1521_v1 }
 0x380   : > { %v918_v23 = vpop.permute.xlu0 %917 }
 0x381   : > { %1392 = vmatmul.mubr.msk.bf16.vlgmr.msra.gmra.mrb[4].mxu0 %vm510_vm2, %v569_v14  ;;  %v923_v25 = vsel %vm575_vm3, %v918_v23, 0 }
 0x382   : > { %1402 = vmatpush3.bf16.msra.mxu0 %v689_v16  ;;  %1403 = vmatprep.mubr.msk.bf16.mxu0 %vm1522_vm0, %v1521_v1 }
 0x383   : > { %1413 = vmatprep.subr.bf16.mxu0 %v1521_v1  ;;  %v1506_v18 = vpop.eup %1505 }
 0x384   : > { %v798_v20 = vmul.f32 %v1506_v18, %v1498_v60  ;;  %v1331_v18 = vld [vmem:[%s1787_s8] ss:$0 sm:$0xff] }
 0x386   : > { %v799_v24 = vpack.c.bf16 %v798_v20, %v798_v20 }
 0x389   : > { %1404 = vmatmul.mubr.msk.bf16.vlgmr.msra.gmra.mrb[8].mxu0 %vm510_vm2, %v682_v17  ;;  %v1492_v17 = vld [vmem:[%s1788_s9 + $0x18] sm:$0xff]  }
 0x38a   : > { %1415 = vmatprep.mubr.msk.bf16.mxu0 %vm1522_vm0, %v1521_v1 }
 0x3a5   : > { %v913_v19 = vpop.xlane.xlu1 %912 }
 0x3a6   : > { %1507 = vrcp.f32 %v913_v19 }
 0x3a9   : > { %v801_v21 = vpop.permute.xlu1 %800 }
 0x3aa   : > { %v806_v22 = vsel %vm575_vm3, %v801_v21, 0 }
 0x3ab   : > { %1414 = vmatpush3.bf16.msra.mxu0 %v806_v22 }
 0x3ac   : > { %1425 = vmatprep.subr.bf16.mxu0 %v1521_v1 }
 0x3ae   : > { %1416 = vmatmul.mubr.msk.bf16.vlgmr.msra.gmra.mrb[12].mxu0 %vm510_vm2, %v799_v24 }
 0x3af   : > { %1426 = vmatpush3.bf16.msra.mxu0 %v923_v25  ;;  %1427 = vmatprep.mubr.msk.bf16.mxu0 %vm1522_vm0, %v1521_v1 }
 0x3b0   : > { %v1508_v26 = vpop.eup %1507  ;;  %1439 = vmatprep.subr.bf16.mxu0 %v1521_v1 }
 0x3b1   : > { %v915_v27 = vmul.f32 %v1508_v26, %v1500_v2  ;;  %v1487_v2 = vld [vmem:[%s1786_s7] sm:$0xff]  }
 0x3b3   : > { %v916_v28 = vpack.c.bf16 %v915_v27, %v915_v27 }
 0x3b6   : > { %1428 = vmatmul.mubr.msk.bf16.vlgmr.msra.gmra.mrb[16].mxu0 %vm510_vm2, %v916_v28 }
 0x3b7   : > { %1443 = vmatprep.mubr.msk.bf16.mxu0 %vm1522_vm0, %v1521_v1  ;;  %1440 = vmatpush3.bf16.msra.mxu0 %v1487_v2 }
 0x3b8   : > { %1441 = vmatprep.subr.bf16.mxu0 %v1521_v1 }
 0x454   : > { %v613_v29 = vpop.f32.mrb[4].mxu0 }
 0x455   : > { %619 = vst.msk [vmem:[#allocation2] sm:$0xff] %vm510_vm2, %v613_v29  ;;  %v1393_v30 = vpop.f32.mrb[5].mxu0 }
 0x456   : > { %v616_v31 = vpop.f32.mrb[6].mxu0 }
 0x457   : > { %v1394_v32 = vpop.f32.mrb[7].mxu0 }
 0x45c   : > { %v725_v33 = vpop.f32.mrb[8].mxu0 }
 0x45d   : > { %732 = vrot.lane.b32.xlu1 %v725_v33, %s1534_s17  ;;  %v1405_v34 = vpop.f32.mrb[9].mxu0 }
 0x45e   : > { %v728_v35 = vpop.f32.mrb[10].mxu0 }
 0x45f   : > { %v1406_v36 = vpop.f32.mrb[11].mxu0 }
 0x481   : > { %v842_v39 = vpop.f32.mrb[12].mxu0 }
 0x482   : > { %849 = vrot.lane.b32.xlu0 %v842_v39, %s1535_s22  ;;  %v1417_v40 = vpop.f32.mrb[13].mxu0 }
 0x483   : > { %v845_v41 = vpop.f32.mrb[14].mxu0 }
 0x484   : > { %v1418_v42 = vpop.f32.mrb[15].mxu0 }
 0x485   : > { %v1341_v42 = vld [vmem:[%s1790_s11] ss:$0 sm:$0xff] }
 0x489   : > { %v959_v43 = vpop.f32.mrb[16].mxu0 }
 0x48a   : > { %966 = vrot.lane.b32.xlu1 %v959_v43, %s1536_s23  ;;  %v1429_v44 = vpop.f32.mrb[17].mxu0 }
 0x48b   : > { %v962_v45 = vpop.f32.mrb[18].mxu0  ;;  %v1342_v44 = vld [vmem:[%s1791_s12] ss:$0 sm:$0xff] }
 0x48c   : > { %v1430_v46 = vpop.f32.mrb[19].mxu0 }
 0x4cf   : > { %v733_v47 = vpop.permute.xlu1 %732 }
 0x4d0   : > { %736 = vst.msk [vmem:[#allocation2] sm:$0xff] %vm735_vm4, %v733_v47 }
 0x4f4   : > { %v850_v48 = vpop.permute.xlu0 %849 }
 0x4f5   : > { %853 = vst.msk [vmem:[#allocation2] sm:$0xff] %vm852_vm5, %v850_v48 }
 0x4fc   : > { %v967_v49 = vpop.permute.xlu1 %966 }
 0x4fd   : > { %970 = vst.msk [vmem:[#allocation2] sm:$0xff] %vm969_vm6, %v967_v49 }
 0x504   : > { %v971_v50 = vld [vmem:[#allocation2] sm:$0xff] }
 0x505   : > { %v972_v51 = vpack.c.bf16 %v971_v50, %v971_v50 }
 0x507   : > { %1436 = vmatmul.mubr.msk.bf16.vlgmr.msra.gmra.mrb[16].mxu1 %vm462_vm1, %v972_v51 }
 0x508   : > { %1455 = vmatprep.mubr.msk.bf16.mxu1 %vm1522_vm0, %v1521_v1  ;;  %1448 = vmatpush3.bf16.msra.mxu1 %v1489_v4 }
 0x509   : > { %1449 = vmatprep.subr.bf16.mxu1 %v1521_v1 }
 0x50c   : > { %1450 = vmatpush3.bf16.msra.mxu1 %v1490_v5 }
 0x50d   : > { %1451 = vmatprep.subr.bf16.mxu1 %v1521_v1 }
 0x510   : > { %1452 = vmatpush3.bf16.msra.mxu1 %v1491_v10 }
 0x511   : > { %1453 = vmatprep.subr.bf16.mxu1 %v1521_v1  ;;  %v1335_v1 = vld [vmem:[%s1789_s10] ss:$0 sm:$0xff] }
 0x514   : > { %1454 = vmatpush3.bf16.msra.mxu1 %v1492_v17 }
 0x5da   : > { %v1033_v53 = vpop.f32.mrb[16].mxu1 }
 0x5db   : > { %v1034_v54 = vadd.f32 %v1325_v52, %v1033_v53  ;;  %v1437_v55 = vpop.f32.mrb[17].mxu1 }
 0x5dc   : > { %v1036_v56 = vpop.f32.mrb[18].mxu1 }
 0x5dd   : > { %v1438_v57 = vpop.f32.mrb[19].mxu1  ;;  %v1039_v58 = vadd.f32 %v1034_v54, %v1637_v3  ;;  %v1488_v3 = vld [vmem:[%s1786_s7 + $0x8] sm:$0xff]  }
 0x5de   : > { %1442 = vmatpush3.bf16.msra.mxu0 %v1488_v3 }
 0x5df   : > { %v1042_v59 = vsel %vm462_vm1, %v1039_v58, 0.0 }
 0x5e0   : > { %1043 = vadd.xlane.f32.xlu0 %v1042_v59 }
 0x66d   : > { %v1044_v60 = vpop.xlane.xlu0 %1043 }
 0x66e   : > { %v1046_v61 = vmul.f32 0.03125, %v1044_v60 }
 0x670   : > { %v1047_v62 = vsub.f32 %v1039_v58, %v1046_v61 }
 0x672   : > { %v1048_v63 = vmul.f32 %v1047_v62, %v1047_v62 }
 0x674   : > { %v1049_v0 = vsel %vm462_vm1, %v1048_v63, 0.0 }
 0x675   : > { %1050 = vadd.xlane.f32.xlu1 %v1049_v0 }
 0x702   : > { %v1051_v6 = vpop.xlane.xlu1 %1050 }
 0x703   : > { %v1052_v7 = vmul.f32 0.03125, %v1051_v6 }
 0x705   : > { %v1053_v8 = vadd.f32 1e-05, %v1052_v7 }
 0x707   : > { %1509 = vrsqrt.f32 %v1053_v8 }
 0x711   : > { %v1510_v9 = vpop.eup %1509 }
 0x712   : > { %v1055_v12 = vmul.f32 %v1510_v9, %v1047_v62 }
 0x714   : > { %v1062_v14 = vmul.f32 %v1329_v11, %v1055_v12 }
 0x716   : > { %v1069_v15 = vadd.f32 %v1330_v13, %v1062_v14 }
 0x718   : > { %v1070_v16 = vpack.c.bf16 %v1069_v15, %v1069_v15 }
 0x71a   : > { %1444 = vmatmul.mubr.msk.bf16.vlgmr.msra.gmra.mrb[20].mxu0 %vm462_vm1, %v1070_v16 }
 0x7ed   : > { %v1131_v19 = vpop.f32.mrb[20].mxu0 }
 0x7ee   : > { %v1132_v20 = vadd.f32 %v1331_v18, %v1131_v19  ;;  %v1445_v21 = vpop.f32.mrb[21].mxu0 }
 0x7ef   : > { %v1134_v22 = vpop.f32.mrb[22].mxu0 }
 0x7f0   : > { %v1137_v23 = vmax.f32 %v1132_v20, 0.0  ;;  %v1446_v24 = vpop.f32.mrb[23].mxu0 }
 0x7f2   : > { %v1138_v25 = vpack.c.bf16 %v1137_v23, %v1137_v23 }
 0x7f4   : > { %1456 = vmatmul.mubr.msk.bf16.vlgmr.msra.gmra.mrb[20].mxu1 %vm1178_vm7, %v1138_v25 }
 0x8c7   : > { %v1216_v26 = vpop.f32.mrb[20].mxu1 }
 0x8c8   : > { %v1217_v27 = vadd.f32 %v1335_v1, %v1216_v26  ;;  %v1457_v28 = vpop.f32.mrb[21].mxu1 }
 0x8c9   : > { %v1219_v29 = vpop.f32.mrb[22].mxu1 }
 0x8ca   : > { %v1458_v30 = vpop.f32.mrb[23].mxu1  ;;  %v1222_v31 = vadd.f32 %v1217_v27, %v1069_v15 }
 0x8cc   : > { %v1225_v32 = vsel %vm462_vm1, %v1222_v31, 0.0 }
 0x8cd   : > { %1226 = vadd.xlane.f32.xlu0 %v1225_v32 }
 0x95a   : > { %v1227_v33 = vpop.xlane.xlu0 %1226 }
 0x95b   : > { %v1228_v34 = vmul.f32 0.03125, %v1227_v33 }
 0x95d   : > { %v1229_v35 = vsub.f32 %v1222_v31, %v1228_v34 }
 0x95f   : > { %v1230_v36 = vmul.f32 %v1229_v35, %v1229_v35 }
 0x961   : > { %v1231_v37 = vsel %vm462_vm1, %v1230_v36, 0.0 }
 0x962   : > { %1232 = vadd.xlane.f32.xlu0 %v1231_v37 }
 0x9ef   : > { %v1233_v38 = vpop.xlane.xlu0 %1232 }
 0x9f0   : > { %v1234_v39 = vmul.f32 0.03125, %v1233_v38 }
 0x9f2   : > { %v1235_v40 = vadd.f32 1e-05, %v1234_v39 }
 0x9f4   : > { %1511 = vrsqrt.f32 %v1235_v40 }
 0x9fe   : > { %v1512_v41 = vpop.eup %1511 }
 0x9ff   : > { %v1237_v43 = vmul.f32 %v1512_v41, %v1229_v35 }
 0xa01   : > { %v1244_v45 = vmul.f32 %v1341_v42, %v1237_v43 }
 0xa03   : > { %v1251_v46 = vadd.f32 %v1342_v44, %v1244_v45 }
 0xa05   : > { %1252 = vst.msk [vmem:[%s435_s24] sm:$0xff] %vm462_vm1, %v1251_v46 }
 0xa06 PF: > { %s23_s25 = sadd.s32 1, %s1519_s25  }
 0xa07   : > { %p20_p4 = scmp.ge.s32.totalorder %s23_s25, 4  }
 0xa09   :  { %22 = sbr.rel (!%p20_p4) target bundleno = 1 (0x1), region = 102 }

// kernel: simple_transformer_forward.7
= control target key start
LH: loop header
LB: loop body
LE: loop exit
PB: predicated region body
PF: predicated region fallthrough
CT: control target
= control target key end

     0   :  { %s655_s24 = smov 0   ;;  %s698_s0 = inlined_call_operand.vmem [shape: f32[2,8,32], index: 0, kind: input, shape index: {}]   ;;  %s699_s1 = inlined_call_operand.vmem [shape: f32[2,8,16], index: 1, kind: input, shape index: {}]   ;;  %s700_s2 = inlined_call_operand.vmem [shape: f32[2,8,1], index: 2, kind: input, shape index: {}]   ;;  %s701_s3 = inlined_call_operand.vmem [shape: bf16[32,16], index: 3, kind: input, shape index: {}]   ;;  %s702_s4 = inlined_call_operand.vmem [shape: f32[1,16], index: 4, kind: input, shape index: {}]   ;;  %s703_s5 = inlined_call_operand.vmem [shape: f32[2,8,16], index: 5, kind: output, shape index: {0}]   ;;  %s704_s6 = inlined_call_operand.vmem [shape: f32[2,1,1], index: 6, kind: output, shape index: {1}]   ;;  %s705_s7 = inlined_call_operand.vmem [shape: f32[2,1,1], index: 7, kind: output, shape index: {2}]  }
   0x1 LB: > { %s560_s25 = sadd.s32 4294967295, %s610_s24   ;;  %p564_p0 = scmp.ge.s32.totalorder %s610_s24, 1  ;;  %s610_s24 = sphi %s655_s24, %s18_s24  }
   0x2   : > { %p259_p1 = scmp.lt.s32.totalorder %s610_s24, 3 }
   0x4   : > { %p260_p2 = pnand %p564_p0, %p259_p1 }
   0x5   : > { %v602_v0 = vld [vmem:[%s701_s3] sm:$0xff] (!%p260_p2)   ;;  %v612_v1 = vmov (!%p260_p2), 0.0   ;;  %v603_v2 = vld [vmem:[%s701_s3 + $0x8] sm:$0xff] (!%p260_p2)   ;;  %vm613_vm0 = vmmov (!%p260_p2), 0   ;;  %p303_p3 = scmp.lt.s32.totalorder (!%p260_p2), %s560_s25, 1  ;;  %v614_v3 = vmov (!%p260_p2), 0  }
   0x6   : > { %263 = sbr.rel (%p260_p2) target bundleno = 447 (0x1bf), region = 40  ;;  %578 = vmatprep.subr.bf16.mxu0 (!%p260_p2), %v612_v1  ;;  %582 = vmatprep.mubr.msk.bf16.mxu0 (!%p260_p2), %vm613_vm0, %v612_v1  ;;  %vm351_vm1 = vcmask (!%p260_p2), 261120   ;;  %vm420_vm2 = vcmask (!%p260_p2), 7168   ;;  %v569_v8 = vld [vmem:[%s702_s4] ss:$0 sm:$0xff] (!%p260_p2)  ;;  %vm395_vm3 = vcmask (!%p260_p2), 130048  }
   0x7   : > { %579 = vmatpush3.bf16.msra.mxu0 (!%p260_p2), %v602_v0  ;;  %601 = vset.pattern.permute.xlu0 (!%p260_p2), %v614_v3  ;;  %vm418_vm4 = vcmask (!%p260_p2), 0  }
   0x8   : > { %580 = vmatprep.subr.bf16.mxu0 (!%p260_p2), %v612_v1 }
   0xb   : > { %581 = vmatpush3.bf16.msra.mxu0 (!%p260_p2), %v603_v2 }
   0xd   : > { %s707_s25 = smov (!%p303_p3, %s560_s25), 1 }
   0xe   : > { %s565_s30 = sshll.u32 %s707_s25, 3  ;;  %s321_s26 = scalar_lea.vmem %s704_s6, %s707_s25 }
   0xf   : > { %s306_s10 = scalar_lea.vmem %s698_s0, %s565_s30  ;;  %s314_s13 = scalar_lea.vmem %s700_s2, %s565_s30 }
  0x10   : > { %v326_v4 = vld [vmem:[%s306_s10] sm:$0xff]  ;;  %s310_s16 = scalar_lea.vmem %s699_s1, %s565_s30  ;;  %s318_s21 = scalar_lea.vmem %s703_s5, %s565_s30 }
  0x11   : > { %v397_v5 = vld [vmem:[%s314_s13] sm:$0xff]  ;;  %v327_v6 = vpack.c.bf16 %v326_v4, %v326_v4  ;;  %s324_s30 = scalar_lea.vmem %s705_s7, %s707_s25 }
  0x12   : > { %402 = vperm.xlu0 %601, %v397_v5   ;;  %v421_v7 = vsel %vm420_vm2, %v397_v5, 0.0  ;;  %v398_v10 = vld [vmem:[%s310_s16] sm:$0xff] }
  0x13   : > { %583 = vmatmul.mubr.msk.bf16.vlgmr.msra.gmra.mrb[0].mxu0 %vm351_vm1, %v327_v6  ;;  %422 = vadd.xlane.f32.xlu1 %v421_v7 }
  0x91   : > { %v403_v14 = vpop.permute.xlu0 %402 }
  0xa0   : > { %v423_v20 = vpop.xlane.xlu1 %422 }
  0xa1   : > { %v424_v21 = vrot.slane %v423_v20, 4 }
  0xa3   : > { %v425_v22 = vadd.f32 %v424_v21, %v423_v20 }
  0xa5   : > { %v426_v23 = vrot.slane %v425_v22, 2 }
  0xa7   : > { %v427_v27 = vadd.f32 %v426_v23, %v425_v22 }
  0xa9   : > { %v428_v30 = vrot.slane %v427_v27, 1 }
  0xab   : > { %v429_v33 = vadd.f32 %v428_v30, %v427_v27 }
  0xe6   : > { %v389_v9 = vpop.f32.mrb[0].mxu0 }
  0xe7   : > { %v390_v11 = vadd.f32 %v569_v8, %v389_v9  ;;  %v584_v12 = vpop.f32.mrb[1].mxu0 }
  0xe8   : > { %v392_v13 = vpop.f32.mrb[2].mxu0 }
  0xe9   : > { %v585_v15 = vpop.f32.mrb[3].mxu0  ;;  %v399_v16 = vsub.f32 %v390_v11, %v398_v10  ;;  %396 = vst.msk [vmem:[%s318_s21] sm:$0xff] %vm395_vm3, %v390_v11 }
  0xeb   : > { %v405_v17 = vmul.f32 %v403_v14, %v399_v16 }
  0xed   : > { %v406_v18 = vmul.f32 %v405_v17, %v405_v17 }
  0xef   : > { %v407_v19 = vsel %vm395_vm3, %v406_v18, 0.0 }
  0xf0   : > { %408 = vadd.xlane.f32.xlu0 %v407_v19 }
 0x17d   : > { %v409_v24 = vpop.xlane.xlu0 %408 }
 0x17e   : > { %v410_v25 = vrot.slane %v409_v24, 4 }
 0x180   : > { %v411_v26 = vadd.f32 %v410_v25, %v409_v24 }
 0x182   : > { %v412_v28 = vrot.slane %v411_v26, 2 }
 0x184   : > { %v413_v29 = vadd.f32 %v412_v28, %v411_v26 }
 0x186   : > { %v414_v31 = vrot.slane %v413_v29, 1 }
 0x188   : > { %v415_v32 = vadd.f32 %v414_v31, %v413_v29 }
 0x18a   : > { %586 = vpush %v415_v32 }
 0x18b   : > { %588 = vpush %v429_v33 }
 0x1bb   : > { %s587_s27 = spop %586 }
 0x1bc   : > { %v417_v34 = vstv %s587_s27  ;;  %s589_s8 = spop %588 }
 0x1bd   : > { %419 = vst.msk [vmem:[%s321_s26] sm:$0x1] %vm418_vm4, %v417_v34  ;;  %v431_v35 = vstv %s589_s8 }
 0x1be   : > { %432 = vst.msk [vmem:[%s324_s30] sm:$0x1] %vm418_vm4, %v431_v35 }
 0x1bf PF: > { %s18_s24 = sadd.s32 1, %s610_s24  }
 0x1c0   : > { %p15_p4 = scmp.ge.s32.totalorder %s18_s24, 4  }
 0x1c2   :  { %17 = sbr.rel (!%p15_p4) target bundleno = 1 (0x1), region = 100 }

</bundles_post_ra>
